<compile_context>
chip_gen: v5e
topology: v5e:2x2
jax: 0.10.0
libtpu: 0.0.40
codegen_flags: <defaults>
</compile_context>

<pallas_src>
import functools

import jax
import jax.numpy as jnp
from jax.experimental import pallas as pl
from jax.experimental.pallas import tpu as pltpu

_LANE = 128
_NEG_SLOPE = 0.2


def _round_up(a, b):
    return (a + b - 1) // b * b


def _vmem_limit_bytes():
    cap = 128 * 1024 * 1024
    try:
        info = pltpu.get_tpu_info()
        cap = int(getattr(info, "vmem_capacity_bytes", cap))
    except Exception:
        pass
    return min(cap // 2, 64 * 1024 * 1024)


def _taps_for_stride(stride):
    """(row offset in band, phase, output col shift) per 3x3 tap, ky-major."""
    taps = []
    for ky in range(3):
        for kx in range(3):
            if stride == 1:
                taps.append((ky, 0, kx))
            else:  # stride 2 via space-to-depth; phase q = 2*(ky%2) + (kx%2)
                taps.append((1 + ky // 2, 2 * (ky % 2) + (kx % 2), kx // 2))
    return tuple(taps)


def _pick_row_tile(ho, wo, pw, cin, coutb, out_w, s_ch, budget, p_cap=512):
    """Largest divisor th of ho with th*wo <= p_cap and a VMEM-fit estimate."""
    band_row = pw * cin * 2                        # bf16 bytes per prep row
    best = 1
    for th in range(1, ho + 1):
        if ho % th:
            continue
        est = (2 * (th + 2) * band_row             # haloed band blocks (2 bufs)
               + th * wo * coutb * 4               # f32 accumulator
               + 2 * th * out_w * coutb * 2        # output block (2 bufs)
               + 2 * th * max(wo, 8) * s_ch * 2)   # shortcut block (2 bufs)
        if th * wo <= p_cap and est <= budget:
            best = th
    return best


# ----------------------------- Pallas kernel body ----------------------------

def _make_conv_kernel(taps, th, wo, pph, shortcut, out_w, halo_zero):
    """3x3 conv (via shifted matmuls) [+ shortcut add] + LeakyReLU, bf16 out."""

    def kernel(*refs):
        if shortcut == "conv":
            top_ref, main_ref, bot_ref, w_ref, s_ref, sw_ref, o_ref = refs
        elif shortcut == "id":
            top_ref, main_ref, bot_ref, w_ref, s_ref, o_ref = refs
        else:
            top_ref, main_ref, bot_ref, w_ref, o_ref = refs

        i = pl.program_id(2)
        pw, cin = main_ref.shape[2], main_ref.shape[3]
        wslab = pw // pph
        coutb = o_ref.shape[3]

        top = top_ref[...].reshape(1, pw, cin)
        bot = bot_ref[...].reshape(1, pw, cin)
        if halo_zero:  # image-boundary rows are conv zero padding
            top = jnp.where(i == 0, jnp.zeros_like(top), top)
            bot = jnp.where(i == pl.num_programs(2) - 1, jnp.zeros_like(bot), bot)
        band = jnp.concatenate(
            [top, main_ref[...].reshape(th, pw, cin), bot], axis=0)

        acc = jnp.zeros((th, wo, coutb), jnp.float32)
        for t, (ro, ph, cs) in enumerate(taps):
            # leading-dim / 8-aligned slices only; no relayout, stays bf16.
            slab = band[ro:ro + th, ph * wslab:(ph + 1) * wslab, :]
            slab = slab.reshape(th * wslab, cin)
            m = jnp.dot(slab, w_ref[t], preferred_element_type=jnp.float32)
            m = m.reshape(th, wslab, coutb)
            acc = acc + m[:, cs:cs + wo, :]        # kx shift on the f32 result

        if shortcut == "conv":
            wos, scs = s_ref.shape[2], s_ref.shape[3]
            sm = jnp.dot(s_ref[...].reshape(th * wos, scs), sw_ref[...],
                         preferred_element_type=jnp.float32)
            acc = acc + sm.reshape(th, wos, coutb)[:, :wo, :]
        elif shortcut == "id":
            acc = acc + s_ref[...].reshape(th, wo, coutb).astype(jnp.float32)

        acc = jnp.where(acc >= 0, acc, _NEG_SLOPE * acc)
        res = acc.astype(o_ref.dtype)
        if out_w != wo:  # emit zero W borders so the next kernel reads halos directly
            res = jnp.pad(res, ((0, 0), (1, out_w - wo - 1), (0, 0)))
        o_ref[...] = res.reshape(1, th, out_w, coutb)

    return kernel


# ----------------------------- pallas_call wrapper ---------------------------

def _conv3x3_block(prep, wtap, *, ho, wo, pph, taps, halo_zero, out_w,
                   shortcut=None, s_arr=None, sw=None):
    """prep: (N, Hp, pph*wslab, Cin) bf16 band source; wtap: (9, Cin, Coutp) bf16."""
    n, hp, pw, cin = prep.shape
    coutp = wtap.shape[2]
    vmem_limit = _vmem_limit_bytes()

    # Weight residency gate: keep the full weight resident when small; else tile
    # Cout and make it the outermost grid axis (weight slab fetched once per j).
    full_w_bytes = 2 * wtap.size + (2 * sw.size if sw is not None else 0)
    if full_w_bytes <= min(6 << 20, vmem_limit // 4):
        coutb = coutp
    else:
        coutb = 256 if coutp % 256 == 0 else _LANE
    jt = coutp // coutb

    s_ch = 0
    if shortcut == "conv":
        s_ch = s_arr.shape[3]
    elif shortcut == "id":
        s_ch = coutb
    w_block_bytes = 4 * 9 * cin * coutb + (4 * s_ch * coutb if sw is not None else 0)
    th = _pick_row_tile(ho, wo, pw, cin, coutb, out_w, s_ch,
                        budget=vmem_limit // 2 - w_block_bytes)
    grid = (jt, n, ho // th)

    in_specs = [
        pl.BlockSpec((1, 1, pw, cin),
                     lambda j, b, i: (b, jnp.maximum(i * th - 1, 0), 0, 0)),
        pl.BlockSpec((1, th, pw, cin), lambda j, b, i: (b, i, 0, 0)),
        pl.BlockSpec((1, 1, pw, cin),
                     lambda j, b, i: (b, jnp.minimum(i * th + th, hp - 1), 0, 0)),
        pl.BlockSpec((9, cin, coutb), lambda j, b, i: (0, 0, j)),
    ]
    args = [prep, prep, prep, wtap]
    if shortcut == "conv":
        in_specs += [
            pl.BlockSpec((1, th, s_arr.shape[2], s_arr.shape[3]),
                         lambda j, b, i: (b, i, 0, 0)),
            pl.BlockSpec((s_arr.shape[3], coutb), lambda j, b, i: (0, j)),
        ]
        args += [s_arr, sw]
    elif shortcut == "id":
        in_specs += [pl.BlockSpec((1, th, wo, coutb),
                                  lambda j, b, i: (b, i, 0, j))]
        args += [s_arr]

    kernel = _make_conv_kernel(taps, th, wo, pph, shortcut, out_w, halo_zero)
    return pl.pallas_call(
        kernel,
        out_shape=jax.ShapeDtypeStruct((n, ho, out_w, coutp), jnp.bfloat16),
        grid=grid,
        in_specs=in_specs,
        out_specs=pl.BlockSpec((1, th, out_w, coutb),
                               lambda j, b, i: (b, i, 0, j)),
        compiler_params=pltpu.CompilerParams(
            dimension_semantics=("parallel", "parallel", "parallel"),
            vmem_limit_bytes=vmem_limit),
    )(*args)


# --------------------------------- JAX glue ----------------------------------

def spectral_normalize(w, n_iter=30):
    """w / sigma_max(w.reshape(out_ch, -1)).

    torch.nn.utils.spectral_norm semantics, but with a fresh in-graph power
    iteration instead of torch's persistent one-step running estimate of u."""
    out_ch = w.shape[0]
    wm = w.reshape(out_ch, -1).astype(jnp.float32)
    u0 = jnp.ones((out_ch,), jnp.float32) / jnp.sqrt(out_ch)

    def body(_, u):
        v = wm.T @ u
        v = v / (jnp.linalg.norm(v) + 1e-12)
        u = wm @ v
        return u / (jnp.linalg.norm(u) + 1e-12)

    u = jax.lax.fori_loop(0, n_iter, body, u0)
    v = wm.T @ u
    v = v / (jnp.linalg.norm(v) + 1e-12)
    sigma = u @ (wm @ v)
    return w / sigma


@functools.partial(jax.jit, static_argnames=("downsample",))
def resblock_d_forward(x_nchw, params, downsample):
    """ResBlockD forward. x_nchw: (N, Cin, H, W) f32 -> (N, Cout, Ho, Wo) f32."""
    stride = 2 if downsample else 1
    x = jnp.transpose(x_nchw, (0, 2, 3, 1)).astype(jnp.float32)   # NCHW -> NHWC
    n, h, w, cin = x.shape
    if downsample:
        assert h % 2 == 0 and w % 2 == 0, "downsample path assumes even H and W"
    ho, wo = (h // 2, w // 2) if downsample else (h, w)

    w1 = spectral_normalize(params["w1"])             # (Cout, Cin, 3, 3)
    w2 = spectral_normalize(params["w2"])             # (Cout, Cout, 3, 3)
    cout = w1.shape[0]
    coutp = _round_up(cout, _LANE)
    x_bf = x.astype(jnp.bfloat16)

    w1t = jnp.transpose(w1, (2, 3, 1, 0)).reshape(9, cin, cout)
    w1t = jnp.pad(w1t, ((0, 0), (0, 0), (0, coutp - cout))).astype(jnp.bfloat16)
    w2t = jnp.transpose(w2, (2, 3, 1, 0)).reshape(9, cout, cout)
    w2t = jnp.pad(w2t, ((0, 0), (0, coutp - cout),
                        (0, coutp - cout))).astype(jnp.bfloat16)

    # ---- conv1 band source, built in one XLA pass over x (no 9x im2col) ----
    if stride == 1:
        w1slab = _round_up(w + 2, 8)
        prep1 = jnp.pad(x_bf, ((0, 0), (0, 0), (1, w1slab - w - 1), (0, 0)))
        pph1 = 1
    else:
        # space-to-depth: 4 phases of the padded input; the 3x3/stride-2 conv
        # becomes 9 phase-selected, unit-shifted matmuls over this tensor.
        w1slab = _round_up(wo + 1, 8)
        xpad = jnp.pad(x_bf, ((0, 0), (1, 1), (1, 1), (0, 0)))
        phases = [xpad[:, pr::2, pc::2, :] for pr in (0, 1) for pc in (0, 1)]
        s2d = jnp.stack(phases, axis=2)               # (N, ho+1, 4, wo+1, Cin)
        s2d = jnp.pad(s2d, ((0, 0), (0, 0), (0, 0),
                            (0, w1slab - (wo + 1)), (0, 0)))
        prep1 = s2d.reshape(n, ho + 1, 4 * w1slab, cin)
        pph1 = 4

    w2slab = _round_up(wo + 2, 8)

    # ---- kernel 1: conv1 + LeakyReLU -> W-padded bf16 h1 (no XLA repack) ----
    h1 = _conv3x3_block(prep1, w1t, ho=ho, wo=wo, pph=pph1,
                        taps=_taps_for_stride(stride), halo_zero=(stride == 1),
                        out_w=w2slab)                 # (N, ho, w2slab, Coutp)

    # ---- shortcut operand ----
    if downsample or cin != cout:
        ws = spectral_normalize(params["ws"])         # (Cout, Cin, 1, 1)
        swm = jnp.transpose(ws, (2, 3, 1, 0)).reshape(cin, cout)
        swm = jnp.pad(swm, ((0, 0), (0, coutp - cout))).astype(jnp.bfloat16)
        xs = x_bf[:, ::stride, ::stride, :][:, :ho, :wo, :]
        xs = jnp.pad(xs, ((0, 0), (0, 0), (0, _round_up(wo, 8) - wo), (0, 0)))
        shortcut, s_arr, sw = "conv", xs, swm
    else:
        s_arr = x_bf
        if cout != coutp:
            # TODO(synk): pad the missing lanes in-kernel instead of streaming
            # zero channels through HBM (only hit when Cout % 128 != 0).
            s_arr = jnp.pad(x_bf, ((0, 0), (0, 0), (0, 0), (0, coutp - cout)))
        shortcut, sw = "id", None

    # ---- kernel 2: conv2 + shortcut + residual add + LeakyReLU (fused) ----
    out = _conv3x3_block(h1, w2t, ho=ho, wo=wo, pph=1,
                         taps=_taps_for_stride(1), halo_zero=True, out_w=wo,
                         shortcut=shortcut, s_arr=s_arr, sw=sw)   # bf16

    out = out[..., :cout]                              # epilogue stays bf16
    return jnp.transpose(out, (0, 3, 1, 2)).astype(jnp.float32)   # NHWC -> NCHW


# ------------------------------ pure-JAX reference ---------------------------

def _ref_conv(x_nhwc, w_torch, stride, pad):
    return jax.lax.conv_general_dilated(
        x_nhwc, jnp.transpose(w_torch, (2, 3, 1, 0)),
        window_strides=(stride, stride),
        padding=[(pad, pad), (pad, pad)],
        dimension_numbers=("NHWC", "HWIO", "NHWC"))


def _lrelu(x):
    return jnp.where(x >= 0, x, _NEG_SLOPE * x)


def ref_forward(x_nchw, params, downsample):
    stride = 2 if downsample else 1
    x = jnp.transpose(x_nchw, (0, 2, 3, 1)).astype(jnp.float32)
    w1 = spectral_normalize(params["w1"])
    w2 = spectral_normalize(params["w2"])
    cin, cout = x.shape[-1], w1.shape[0]
    if downsample or cin != cout:
        ws = spectral_normalize(params["ws"])
        identity = _ref_conv(x, ws, stride, 0)
    else:
        identity = x
    out = _lrelu(_ref_conv(x, w1, stride, 1))
    out = _ref_conv(out, w2, 1, 1) + identity
    out = _lrelu(out)
    return jnp.transpose(out, (0, 3, 1, 2))


# ----------------------------------- main ------------------------------------

if __name__ == "__main__":
    key = jax.random.PRNGKey(0)
    k1, k2, k3, k4, k5, kx, kx2 = jax.random.split(key, 7)

    # Case 1: downsample, in_ch != out_ch (strided 1x1 conv shortcut).
    n, in_ch, out_ch, h = 2, 4, 8, 16
    params = {
        "w1": 0.1 * jax.random.normal(k1, (out_ch, in_ch, 3, 3), jnp.float32),
        "w2": 0.1 * jax.random.normal(k2, (out_ch, out_ch, 3, 3), jnp.float32),
        "ws": 0.1 * jax.random.normal(k3, (out_ch, in_ch, 1, 1), jnp.float32),
    }
    x = jax.random.normal(kx, (n, in_ch, h, h), jnp.float32)       # NCHW
    out = jax.block_until_ready(resblock_d_forward(x, params, downsample=True))
    ref = jax.block_until_ready(ref_forward(x, params, True))
    assert out.shape == ref.shape == (n, out_ch, h // 2, h // 2), out.shape
    err = float(jnp.max(jnp.abs(out - ref)))
    assert err < 5e-2, f"case1 max abs error {err}"   # bf16 compute, f32 accum

    # Case 2: identity shortcut (no downsample, in_ch == out_ch).
    ch = 8
    params2 = {
        "w1": 0.1 * jax.random.normal(k4, (ch, ch, 3, 3), jnp.float32),
        "w2": 0.1 * jax.random.normal(k5, (ch, ch, 3, 3), jnp.float32),
    }
    x2 = jax.random.normal(kx2, (n, ch, h, h), jnp.float32)
    out2 = jax.block_until_ready(resblock_d_forward(x2, params2, downsample=False))
    ref2 = jax.block_until_ready(ref_forward(x2, params2, False))
    assert out2.shape == ref2.shape == (n, ch, h, h), out2.shape
    err2 = float(jnp.max(jnp.abs(out2 - ref2)))
    assert err2 < 5e-2, f"case2 max abs error {err2}"

    print("KERNEL_OK")
</pallas_src>

<mosaic_0001>
module attributes {stable_mosaic.version = 11 : i64} {
  func.func @kernel(%arg0: i32, %arg1: i32, %arg2: i32, %arg3: memref<1x1x64x4xbf16, #tpu.memory_space<vmem>>, %arg4: memref<1x8x64x4xbf16, #tpu.memory_space<vmem>>, %arg5: memref<1x1x64x4xbf16, #tpu.memory_space<vmem>>, %arg6: memref<9x4x128xbf16, #tpu.memory_space<vmem>>, %arg7: memref<1x8x16x128xbf16, #tpu.memory_space<vmem>>) attributes {dimension_semantics = [#tpu.dimension_semantics<parallel>, #tpu.dimension_semantics<parallel>, #tpu.dimension_semantics<parallel>], iteration_bounds = array<i64: 1, 2, 1>, scalar_prefetch = 0 : i64, scratch_operands = 0 : i64, tpu.core_type = #tpu.core_type<tc>, window_params = [{transform_indices = @transform_0, window_bounds = array<i64: 1, 1, 64, 4>}, {transform_indices = @transform_1, window_bounds = array<i64: 1, 8, 64, 4>}, {transform_indices = @transform_2, window_bounds = array<i64: 1, 1, 64, 4>}, {transform_indices = @transform_3, window_bounds = array<i64: 9, 4, 128>}, {transform_indices = @transform_4, window_bounds = array<i64: 1, 8, 16, 128>}]} {
    %c0 = arith.constant 0 : index
    %c0_0 = arith.constant 0 : index
    %c0_1 = arith.constant 0 : index
    %c0_2 = arith.constant 0 : index
    %0 = vector.load %arg3[%c0, %c0_0, %c0_1, %c0_2] : memref<1x1x64x4xbf16, #tpu.memory_space<vmem>>, vector<1x1x64x4xbf16>
    %1 = vector.shape_cast %0 : vector<1x1x64x4xbf16> to vector<1x64x4xbf16>
    %c0_3 = arith.constant 0 : index
    %c0_4 = arith.constant 0 : index
    %c0_5 = arith.constant 0 : index
    %c0_6 = arith.constant 0 : index
    %2 = vector.load %arg5[%c0_3, %c0_4, %c0_5, %c0_6] : memref<1x1x64x4xbf16, #tpu.memory_space<vmem>>, vector<1x1x64x4xbf16>
    %3 = vector.shape_cast %2 : vector<1x1x64x4xbf16> to vector<1x64x4xbf16>
    %c0_7 = arith.constant 0 : index
    %c0_8 = arith.constant 0 : index
    %c0_9 = arith.constant 0 : index
    %c0_10 = arith.constant 0 : index
    %4 = vector.load %arg4[%c0_7, %c0_8, %c0_9, %c0_10] : memref<1x8x64x4xbf16, #tpu.memory_space<vmem>>, vector<1x8x64x4xbf16>
    %5 = vector.shape_cast %4 : vector<1x8x64x4xbf16> to vector<8x64x4xbf16>
    %6 = tpu.concatenate %1, %5, %3 in 0 : vector<1x64x4xbf16>, vector<8x64x4xbf16>, vector<1x64x4xbf16> -> vector<10x64x4xbf16>
    %cst = arith.constant 0.000000e+00 : f32
    %7 = vector.broadcast %cst : f32 to vector<8x8x128xf32>
    %8 = vector.extract_strided_slice %6 {offsets = [1, 0, 0], sizes = [8, 16, 4], strides = [1, 1, 1]} : vector<10x64x4xbf16> to vector<8x16x4xbf16>
    %9 = vector.shape_cast %8 : vector<8x16x4xbf16> to vector<128x4xbf16>
    %c0_11 = arith.constant 0 : index
    %c0_12 = arith.constant 0 : index
    %c0_13 = arith.constant 0 : index
    %10 = vector.load %arg6[%c0_11, %c0_12, %c0_13] : memref<9x4x128xbf16, #tpu.memory_space<vmem>>, vector<1x4x128xbf16>
    %11 = vector.shape_cast %10 : vector<1x4x128xbf16> to vector<4x128xbf16>
    %cst_14 = arith.constant dense<0.000000e+00> : vector<128x128xf32>
    %12 = tpu.matmul %9, %11, %cst_14 {dimension_numbers = #tpu.dot_dimension_numbers<[1], [0], [0], [1], [0, 0, 1, 1], [], []>} : vector<128x4xbf16>, vector<4x128xbf16>, vector<128x128xf32> -> vector<128x128xf32>
    %13 = vector.shape_cast %12 : vector<128x128xf32> to vector<8x16x128xf32>
    %14 = vector.extract_strided_slice %13 {offsets = [0, 0, 0], sizes = [8, 8, 128], strides = [1, 1, 1]} : vector<8x16x128xf32> to vector<8x8x128xf32>
    %15 = arith.addf %7, %14 : vector<8x8x128xf32>
    %16 = vector.extract_strided_slice %6 {offsets = [1, 16, 0], sizes = [8, 16, 4], strides = [1, 1, 1]} : vector<10x64x4xbf16> to vector<8x16x4xbf16>
    %17 = vector.shape_cast %16 : vector<8x16x4xbf16> to vector<128x4xbf16>
    %c1 = arith.constant 1 : index
    %c0_15 = arith.constant 0 : index
    %c0_16 = arith.constant 0 : index
    %18 = vector.load %arg6[%c1, %c0_15, %c0_16] : memref<9x4x128xbf16, #tpu.memory_space<vmem>>, vector<1x4x128xbf16>
    %19 = vector.shape_cast %18 : vector<1x4x128xbf16> to vector<4x128xbf16>
    %cst_17 = arith.constant dense<0.000000e+00> : vector<128x128xf32>
    %20 = tpu.matmul %17, %19, %cst_17 {dimension_numbers = #tpu.dot_dimension_numbers<[1], [0], [0], [1], [0, 0, 1, 1], [], []>} : vector<128x4xbf16>, vector<4x128xbf16>, vector<128x128xf32> -> vector<128x128xf32>
    %21 = vector.shape_cast %20 : vector<128x128xf32> to vector<8x16x128xf32>
    %22 = vector.extract_strided_slice %21 {offsets = [0, 0, 0], sizes = [8, 8, 128], strides = [1, 1, 1]} : vector<8x16x128xf32> to vector<8x8x128xf32>
    %23 = arith.addf %15, %22 : vector<8x8x128xf32>
    %24 = vector.extract_strided_slice %6 {offsets = [1, 0, 0], sizes = [8, 16, 4], strides = [1, 1, 1]} : vector<10x64x4xbf16> to vector<8x16x4xbf16>
    %25 = vector.shape_cast %24 : vector<8x16x4xbf16> to vector<128x4xbf16>
    %c2 = arith.constant 2 : index
    %c0_18 = arith.constant 0 : index
    %c0_19 = arith.constant 0 : index
    %26 = vector.load %arg6[%c2, %c0_18, %c0_19] : memref<9x4x128xbf16, #tpu.memory_space<vmem>>, vector<1x4x128xbf16>
    %27 = vector.shape_cast %26 : vector<1x4x128xbf16> to vector<4x128xbf16>
    %cst_20 = arith.constant dense<0.000000e+00> : vector<128x128xf32>
    %28 = tpu.matmul %25, %27, %cst_20 {dimension_numbers = #tpu.dot_dimension_numbers<[1], [0], [0], [1], [0, 0, 1, 1], [], []>} : vector<128x4xbf16>, vector<4x128xbf16>, vector<128x128xf32> -> vector<128x128xf32>
    %29 = vector.shape_cast %28 : vector<128x128xf32> to vector<8x16x128xf32>
    %30 = vector.extract_strided_slice %29 {offsets = [0, 1, 0], sizes = [8, 8, 128], strides = [1, 1, 1]} : vector<8x16x128xf32> to vector<8x8x128xf32>
    %31 = arith.addf %23, %30 : vector<8x8x128xf32>
    %32 = vector.extract_strided_slice %6 {offsets = [1, 32, 0], sizes = [8, 16, 4], strides = [1, 1, 1]} : vector<10x64x4xbf16> to vector<8x16x4xbf16>
    %33 = vector.shape_cast %32 : vector<8x16x4xbf16> to vector<128x4xbf16>
    %c3 = arith.constant 3 : index
    %c0_21 = arith.constant 0 : index
    %c0_22 = arith.constant 0 : index
    %34 = vector.load %arg6[%c3, %c0_21, %c0_22] : memref<9x4x128xbf16, #tpu.memory_space<vmem>>, vector<1x4x128xbf16>
    %35 = vector.shape_cast %34 : vector<1x4x128xbf16> to vector<4x128xbf16>
    %cst_23 = arith.constant dense<0.000000e+00> : vector<128x128xf32>
    %36 = tpu.matmul %33, %35, %cst_23 {dimension_numbers = #tpu.dot_dimension_numbers<[1], [0], [0], [1], [0, 0, 1, 1], [], []>} : vector<128x4xbf16>, vector<4x128xbf16>, vector<128x128xf32> -> vector<128x128xf32>
    %37 = vector.shape_cast %36 : vector<128x128xf32> to vector<8x16x128xf32>
    %38 = vector.extract_strided_slice %37 {offsets = [0, 0, 0], sizes = [8, 8, 128], strides = [1, 1, 1]} : vector<8x16x128xf32> to vector<8x8x128xf32>
    %39 = arith.addf %31, %38 : vector<8x8x128xf32>
    %40 = vector.extract_strided_slice %6 {offsets = [1, 48, 0], sizes = [8, 16, 4], strides = [1, 1, 1]} : vector<10x64x4xbf16> to vector<8x16x4xbf16>
    %41 = vector.shape_cast %40 : vector<8x16x4xbf16> to vector<128x4xbf16>
    %c4 = arith.constant 4 : index
    %c0_24 = arith.constant 0 : index
    %c0_25 = arith.constant 0 : index
    %42 = vector.load %arg6[%c4, %c0_24, %c0_25] : memref<9x4x128xbf16, #tpu.memory_space<vmem>>, vector<1x4x128xbf16>
    %43 = vector.shape_cast %42 : vector<1x4x128xbf16> to vector<4x128xbf16>
    %cst_26 = arith.constant dense<0.000000e+00> : vector<128x128xf32>
    %44 = tpu.matmul %41, %43, %cst_26 {dimension_numbers = #tpu.dot_dimension_numbers<[1], [0], [0], [1], [0, 0, 1, 1], [], []>} : vector<128x4xbf16>, vector<4x128xbf16>, vector<128x128xf32> -> vector<128x128xf32>
    %45 = vector.shape_cast %44 : vector<128x128xf32> to vector<8x16x128xf32>
    %46 = vector.extract_strided_slice %45 {offsets = [0, 0, 0], sizes = [8, 8, 128], strides = [1, 1, 1]} : vector<8x16x128xf32> to vector<8x8x128xf32>
    %47 = arith.addf %39, %46 : vector<8x8x128xf32>
    %48 = vector.extract_strided_slice %6 {offsets = [1, 32, 0], sizes = [8, 16, 4], strides = [1, 1, 1]} : vector<10x64x4xbf16> to vector<8x16x4xbf16>
    %49 = vector.shape_cast %48 : vector<8x16x4xbf16> to vector<128x4xbf16>
    %c5 = arith.constant 5 : index
    %c0_27 = arith.constant 0 : index
    %c0_28 = arith.constant 0 : index
    %50 = vector.load %arg6[%c5, %c0_27, %c0_28] : memref<9x4x128xbf16, #tpu.memory_space<vmem>>, vector<1x4x128xbf16>
    %51 = vector.shape_cast %50 : vector<1x4x128xbf16> to vector<4x128xbf16>
    %cst_29 = arith.constant dense<0.000000e+00> : vector<128x128xf32>
    %52 = tpu.matmul %49, %51, %cst_29 {dimension_numbers = #tpu.dot_dimension_numbers<[1], [0], [0], [1], [0, 0, 1, 1], [], []>} : vector<128x4xbf16>, vector<4x128xbf16>, vector<128x128xf32> -> vector<128x128xf32>
    %53 = vector.shape_cast %52 : vector<128x128xf32> to vector<8x16x128xf32>
    %54 = vector.extract_strided_slice %53 {offsets = [0, 1, 0], sizes = [8, 8, 128], strides = [1, 1, 1]} : vector<8x16x128xf32> to vector<8x8x128xf32>
    %55 = arith.addf %47, %54 : vector<8x8x128xf32>
    %56 = vector.extract_strided_slice %6 {offsets = [2, 0, 0], sizes = [8, 16, 4], strides = [1, 1, 1]} : vector<10x64x4xbf16> to vector<8x16x4xbf16>
    %57 = vector.shape_cast %56 : vector<8x16x4xbf16> to vector<128x4xbf16>
    %c6 = arith.constant 6 : index
    %c0_30 = arith.constant 0 : index
    %c0_31 = arith.constant 0 : index
    %58 = vector.load %arg6[%c6, %c0_30, %c0_31] : memref<9x4x128xbf16, #tpu.memory_space<vmem>>, vector<1x4x128xbf16>
    %59 = vector.shape_cast %58 : vector<1x4x128xbf16> to vector<4x128xbf16>
    %cst_32 = arith.constant dense<0.000000e+00> : vector<128x128xf32>
    %60 = tpu.matmul %57, %59, %cst_32 {dimension_numbers = #tpu.dot_dimension_numbers<[1], [0], [0], [1], [0, 0, 1, 1], [], []>} : vector<128x4xbf16>, vector<4x128xbf16>, vector<128x128xf32> -> vector<128x128xf32>
    %61 = vector.shape_cast %60 : vector<128x128xf32> to vector<8x16x128xf32>
    %62 = vector.extract_strided_slice %61 {offsets = [0, 0, 0], sizes = [8, 8, 128], strides = [1, 1, 1]} : vector<8x16x128xf32> to vector<8x8x128xf32>
    %63 = arith.addf %55, %62 : vector<8x8x128xf32>
    %64 = vector.extract_strided_slice %6 {offsets = [2, 16, 0], sizes = [8, 16, 4], strides = [1, 1, 1]} : vector<10x64x4xbf16> to vector<8x16x4xbf16>
    %65 = vector.shape_cast %64 : vector<8x16x4xbf16> to vector<128x4xbf16>
    %c7 = arith.constant 7 : index
    %c0_33 = arith.constant 0 : index
    %c0_34 = arith.constant 0 : index
    %66 = vector.load %arg6[%c7, %c0_33, %c0_34] : memref<9x4x128xbf16, #tpu.memory_space<vmem>>, vector<1x4x128xbf16>
    %67 = vector.shape_cast %66 : vector<1x4x128xbf16> to vector<4x128xbf16>
    %cst_35 = arith.constant dense<0.000000e+00> : vector<128x128xf32>
    %68 = tpu.matmul %65, %67, %cst_35 {dimension_numbers = #tpu.dot_dimension_numbers<[1], [0], [0], [1], [0, 0, 1, 1], [], []>} : vector<128x4xbf16>, vector<4x128xbf16>, vector<128x128xf32> -> vector<128x128xf32>
    %69 = vector.shape_cast %68 : vector<128x128xf32> to vector<8x16x128xf32>
    %70 = vector.extract_strided_slice %69 {offsets = [0, 0, 0], sizes = [8, 8, 128], strides = [1, 1, 1]} : vector<8x16x128xf32> to vector<8x8x128xf32>
    %71 = arith.addf %63, %70 : vector<8x8x128xf32>
    %72 = vector.extract_strided_slice %6 {offsets = [2, 0, 0], sizes = [8, 16, 4], strides = [1, 1, 1]} : vector<10x64x4xbf16> to vector<8x16x4xbf16>
    %73 = vector.shape_cast %72 : vector<8x16x4xbf16> to vector<128x4xbf16>
    %c8 = arith.constant 8 : index
    %c0_36 = arith.constant 0 : index
    %c0_37 = arith.constant 0 : index
    %74 = vector.load %arg6[%c8, %c0_36, %c0_37] : memref<9x4x128xbf16, #tpu.memory_space<vmem>>, vector<1x4x128xbf16>
    %75 = vector.shape_cast %74 : vector<1x4x128xbf16> to vector<4x128xbf16>
    %cst_38 = arith.constant dense<0.000000e+00> : vector<128x128xf32>
    %76 = tpu.matmul %73, %75, %cst_38 {dimension_numbers = #tpu.dot_dimension_numbers<[1], [0], [0], [1], [0, 0, 1, 1], [], []>} : vector<128x4xbf16>, vector<4x128xbf16>, vector<128x128xf32> -> vector<128x128xf32>
    %77 = vector.shape_cast %76 : vector<128x128xf32> to vector<8x16x128xf32>
    %78 = vector.extract_strided_slice %77 {offsets = [0, 1, 0], sizes = [8, 8, 128], strides = [1, 1, 1]} : vector<8x16x128xf32> to vector<8x8x128xf32>
    %79 = arith.addf %71, %78 : vector<8x8x128xf32>
    %cst_39 = arith.constant 0.000000e+00 : f32
    %80 = vector.broadcast %cst_39 : f32 to vector<8x8x128xf32>
    %81 = arith.cmpf oge, %79, %80 : vector<8x8x128xf32>
    %cst_40 = arith.constant 2.000000e-01 : f32
    %82 = vector.broadcast %cst_40 : f32 to vector<8x8x128xf32>
    %83 = arith.mulf %82, %79 : vector<8x8x128xf32>
    %84 = arith.select %81, %79, %83 : vector<8x8x128xi1>, vector<8x8x128xf32>
    %85 = arith.truncf %84 : vector<8x8x128xf32> to vector<8x8x128xbf16>
    %c0_i32 = arith.constant 0 : i32
    %86 = arith.sitofp %c0_i32 : i32 to bf16
    %87 = vector.broadcast %86 : bf16 to vector<8x1x128xbf16>
    %88 = tpu.concatenate %87, %85 in 1 : vector<8x1x128xbf16>, vector<8x8x128xbf16> -> vector<8x9x128xbf16>
    %89 = vector.broadcast %86 : bf16 to vector<8x7x128xbf16>
    %90 = tpu.concatenate %88, %89 in 1 : vector<8x9x128xbf16>, vector<8x7x128xbf16> -> vector<8x16x128xbf16>
    %91 = vector.shape_cast %90 : vector<8x16x128xbf16> to vector<1x8x16x128xbf16>
    %c0_41 = arith.constant 0 : index
    %c0_42 = arith.constant 0 : index
    %c0_43 = arith.constant 0 : index
    %c0_44 = arith.constant 0 : index
    %92 = vector.load %arg7[%c0_41, %c0_42, %c0_43, %c0_44] : memref<1x8x16x128xbf16, #tpu.memory_space<vmem>>, vector<1x8x16x128xbf16>
    tpu.vector_store %arg7[%c0_41, %c0_42, %c0_43, %c0_44], %91 {strides = array<i32>} : memref<1x8x16x128xbf16, #tpu.memory_space<vmem>>, vector<1x8x16x128xbf16>,
    return
  }
  func.func @transform_0(%arg0: i32, %arg1: i32, %arg2: i32) -> (i32, i32, i32, i32) {
    %c8_i32 = arith.constant 8 : i32
    %0 = arith.muli %arg2, %c8_i32 : i32
    %c1_i32 = arith.constant 1 : i32
    %1 = arith.subi %0, %c1_i32 : i32
    %c0_i32 = arith.constant 0 : i32
    %2 = arith.maxsi %1, %c0_i32 : i32
    %c0_i32_0 = arith.constant 0 : i32
    %c0_i32_1 = arith.constant 0 : i32
    %c0_i32_2 = arith.constant 0 : i32
    return %arg1, %2, %c0_i32_0, %c0_i32_1 : i32, i32, i32, i32
  }
  func.func @transform_1(%arg0: i32, %arg1: i32, %arg2: i32) -> (i32, i32, i32, i32) {
    %c0_i32 = arith.constant 0 : i32
    %c0_i32_0 = arith.constant 0 : i32
    %c0_i32_1 = arith.constant 0 : i32
    return %arg1, %arg2, %c0_i32, %c0_i32_0 : i32, i32, i32, i32
  }
  func.func @transform_2(%arg0: i32, %arg1: i32, %arg2: i32) -> (i32, i32, i32, i32) {
    %c8_i32 = arith.constant 8 : i32
    %0 = arith.muli %arg2, %c8_i32 : i32
    %c8_i32_0 = arith.constant 8 : i32
    %1 = arith.addi %0, %c8_i32_0 : i32
    %c8_i32_1 = arith.constant 8 : i32
    %2 = arith.minsi %1, %c8_i32_1 : i32
    %c0_i32 = arith.constant 0 : i32
    %c0_i32_2 = arith.constant 0 : i32
    %c0_i32_3 = arith.constant 0 : i32
    return %arg1, %2, %c0_i32, %c0_i32_2 : i32, i32, i32, i32
  }
  func.func @transform_3(%arg0: i32, %arg1: i32, %arg2: i32) -> (i32, i32, i32) {
    %c0_i32 = arith.constant 0 : i32
    %c0_i32_0 = arith.constant 0 : i32
    %c0_i32_1 = arith.constant 0 : i32
    return %c0_i32, %c0_i32_0, %arg0 : i32, i32, i32
  }
  func.func @transform_4(%arg0: i32, %arg1: i32, %arg2: i32) -> (i32, i32, i32, i32) {
    %c0_i32 = arith.constant 0 : i32
    %c0_i32_0 = arith.constant 0 : i32
    return %arg1, %arg2, %c0_i32, %arg0 : i32, i32, i32, i32
  }
}

module attributes {stable_mosaic.version = 11 : i64} {
  func.func @kernel(%arg0: i32, %arg1: i32, %arg2: i32, %arg3: memref<1x1x16x128xbf16, #tpu.memory_space<vmem>>, %arg4: memref<1x8x16x128xbf16, #tpu.memory_space<vmem>>, %arg5: memref<1x1x16x128xbf16, #tpu.memory_space<vmem>>, %arg6: memref<9x128x128xbf16, #tpu.memory_space<vmem>>, %arg7: memref<1x8x8x4xbf16, #tpu.memory_space<vmem>>, %arg8: memref<4x128xbf16, #tpu.memory_space<vmem>>, %arg9: memref<1x8x8x128xbf16, #tpu.memory_space<vmem>>) attributes {dimension_semantics = [#tpu.dimension_semantics<parallel>, #tpu.dimension_semantics<parallel>, #tpu.dimension_semantics<parallel>], iteration_bounds = array<i64: 1, 2, 1>, scalar_prefetch = 0 : i64, scratch_operands = 0 : i64, tpu.core_type = #tpu.core_type<tc>, window_params = [{transform_indices = @transform_0, window_bounds = array<i64: 1, 1, 16, 128>}, {transform_indices = @transform_1, window_bounds = array<i64: 1, 8, 16, 128>}, {transform_indices = @transform_2, window_bounds = array<i64: 1, 1, 16, 128>}, {transform_indices = @transform_3, window_bounds = array<i64: 9, 128, 128>}, {transform_indices = @transform_4, window_bounds = array<i64: 1, 8, 8, 4>}, {transform_indices = @transform_5, window_bounds = array<i64: 4, 128>}, {transform_indices = @transform_6, window_bounds = array<i64: 1, 8, 8, 128>}]} {
    %c0 = arith.constant 0 : index
    %c0_0 = arith.constant 0 : index
    %c0_1 = arith.constant 0 : index
    %c0_2 = arith.constant 0 : index
    %0 = vector.load %arg3[%c0, %c0_0, %c0_1, %c0_2] : memref<1x1x16x128xbf16, #tpu.memory_space<vmem>>, vector<1x1x16x128xbf16>
    %1 = vector.shape_cast %0 : vector<1x1x16x128xbf16> to vector<1x16x128xbf16>
    %c0_3 = arith.constant 0 : index
    %c0_4 = arith.constant 0 : index
    %c0_5 = arith.constant 0 : index
    %c0_6 = arith.constant 0 : index
    %2 = vector.load %arg5[%c0_3, %c0_4, %c0_5, %c0_6] : memref<1x1x16x128xbf16, #tpu.memory_space<vmem>>, vector<1x1x16x128xbf16>
    %3 = vector.shape_cast %2 : vector<1x1x16x128xbf16> to vector<1x16x128xbf16>
    %c0_i32 = arith.constant 0 : i32
    %4 = arith.cmpi eq, %arg2, %c0_i32 : i32
    %cst = arith.constant 0.000000e+00 : bf16
    %5 = vector.broadcast %cst : bf16 to vector<1x16x128xbf16>
    %6 = arith.select %4, %5, %1 : vector<1x16x128xbf16>
    %c0_i32_7 = arith.constant 0 : i32
    %7 = arith.cmpi eq, %arg2, %c0_i32_7 : i32
    %cst_8 = arith.constant 0.000000e+00 : bf16
    %8 = vector.broadcast %cst_8 : bf16 to vector<1x16x128xbf16>
    %9 = arith.select %7, %8, %3 : vector<1x16x128xbf16>
    %c0_9 = arith.constant 0 : index
    %c0_10 = arith.constant 0 : index
    %c0_11 = arith.constant 0 : index
    %c0_12 = arith.constant 0 : index
    %10 = vector.load %arg4[%c0_9, %c0_10, %c0_11, %c0_12] : memref<1x8x16x128xbf16, #tpu.memory_space<vmem>>, vector<1x8x16x128xbf16>
    %11 = vector.shape_cast %10 : vector<1x8x16x128xbf16> to vector<8x16x128xbf16>
    %12 = tpu.concatenate %6, %11, %9 in 0 : vector<1x16x128xbf16>, vector<8x16x128xbf16>, vector<1x16x128xbf16> -> vector<10x16x128xbf16>
    %cst_13 = arith.constant 0.000000e+00 : f32
    %13 = vector.broadcast %cst_13 : f32 to vector<8x8x128xf32>
    %14 = vector.extract_strided_slice %12 {offsets = [0, 0, 0], sizes = [8, 16, 128], strides = [1, 1, 1]} : vector<10x16x128xbf16> to vector<8x16x128xbf16>
    %15 = vector.shape_cast %14 : vector<8x16x128xbf16> to vector<128x128xbf16>
    %c0_14 = arith.constant 0 : index
    %c0_15 = arith.constant 0 : index
    %c0_16 = arith.constant 0 : index
    %16 = vector.load %arg6[%c0_14, %c0_15, %c0_16] : memref<9x128x128xbf16, #tpu.memory_space<vmem>>, vector<1x128x128xbf16>
    %17 = vector.shape_cast %16 : vector<1x128x128xbf16> to vector<128x128xbf16>
    %cst_17 = arith.constant dense<0.000000e+00> : vector<128x128xf32>
    %18 = tpu.matmul %15, %17, %cst_17 {dimension_numbers = #tpu.dot_dimension_numbers<[1], [0], [0], [1], [0, 0, 1, 1], [], []>} : vector<128x128xbf16>, vector<128x128xbf16>, vector<128x128xf32> -> vector<128x128xf32>
    %19 = vector.shape_cast %18 : vector<128x128xf32> to vector<8x16x128xf32>
    %20 = vector.extract_strided_slice %19 {offsets = [0, 0, 0], sizes = [8, 8, 128], strides = [1, 1, 1]} : vector<8x16x128xf32> to vector<8x8x128xf32>
    %21 = arith.addf %13, %20 : vector<8x8x128xf32>
    %22 = vector.extract_strided_slice %12 {offsets = [0, 0, 0], sizes = [8, 16, 128], strides = [1, 1, 1]} : vector<10x16x128xbf16> to vector<8x16x128xbf16>
    %23 = vector.shape_cast %22 : vector<8x16x128xbf16> to vector<128x128xbf16>
    %c1 = arith.constant 1 : index
    %c0_18 = arith.constant 0 : index
    %c0_19 = arith.constant 0 : index
    %24 = vector.load %arg6[%c1, %c0_18, %c0_19] : memref<9x128x128xbf16, #tpu.memory_space<vmem>>, vector<1x128x128xbf16>
    %25 = vector.shape_cast %24 : vector<1x128x128xbf16> to vector<128x128xbf16>
    %cst_20 = arith.constant dense<0.000000e+00> : vector<128x128xf32>
    %26 = tpu.matmul %23, %25, %cst_20 {dimension_numbers = #tpu.dot_dimension_numbers<[1], [0], [0], [1], [0, 0, 1, 1], [], []>} : vector<128x128xbf16>, vector<128x128xbf16>, vector<128x128xf32> -> vector<128x128xf32>
    %27 = vector.shape_cast %26 : vector<128x128xf32> to vector<8x16x128xf32>
    %28 = vector.extract_strided_slice %27 {offsets = [0, 1, 0], sizes = [8, 8, 128], strides = [1, 1, 1]} : vector<8x16x128xf32> to vector<8x8x128xf32>
    %29 = arith.addf %21, %28 : vector<8x8x128xf32>
    %30 = vector.extract_strided_slice %12 {offsets = [0, 0, 0], sizes = [8, 16, 128], strides = [1, 1, 1]} : vector<10x16x128xbf16> to vector<8x16x128xbf16>
    %31 = vector.shape_cast %30 : vector<8x16x128xbf16> to vector<128x128xbf16>
    %c2 = arith.constant 2 : index
    %c0_21 = arith.constant 0 : index
    %c0_22 = arith.constant 0 : index
    %32 = vector.load %arg6[%c2, %c0_21, %c0_22] : memref<9x128x128xbf16, #tpu.memory_space<vmem>>, vector<1x128x128xbf16>
    %33 = vector.shape_cast %32 : vector<1x128x128xbf16> to vector<128x128xbf16>
    %cst_23 = arith.constant dense<0.000000e+00> : vector<128x128xf32>
    %34 = tpu.matmul %31, %33, %cst_23 {dimension_numbers = #tpu.dot_dimension_numbers<[1], [0], [0], [1], [0, 0, 1, 1], [], []>} : vector<128x128xbf16>, vector<128x128xbf16>, vector<128x128xf32> -> vector<128x128xf32>
    %35 = vector.shape_cast %34 : vector<128x128xf32> to vector<8x16x128xf32>
    %36 = vector.extract_strided_slice %35 {offsets = [0, 2, 0], sizes = [8, 8, 128], strides = [1, 1, 1]} : vector<8x16x128xf32> to vector<8x8x128xf32>
    %37 = arith.addf %29, %36 : vector<8x8x128xf32>
    %38 = vector.extract_strided_slice %12 {offsets = [1, 0, 0], sizes = [8, 16, 128], strides = [1, 1, 1]} : vector<10x16x128xbf16> to vector<8x16x128xbf16>
    %39 = vector.shape_cast %38 : vector<8x16x128xbf16> to vector<128x128xbf16>
    %c3 = arith.constant 3 : index
    %c0_24 = arith.constant 0 : index
    %c0_25 = arith.constant 0 : index
    %40 = vector.load %arg6[%c3, %c0_24, %c0_25] : memref<9x128x128xbf16, #tpu.memory_space<vmem>>, vector<1x128x128xbf16>
    %41 = vector.shape_cast %40 : vector<1x128x128xbf16> to vector<128x128xbf16>
    %cst_26 = arith.constant dense<0.000000e+00> : vector<128x128xf32>
    %42 = tpu.matmul %39, %41, %cst_26 {dimension_numbers = #tpu.dot_dimension_numbers<[1], [0], [0], [1], [0, 0, 1, 1], [], []>} : vector<128x128xbf16>, vector<128x128xbf16>, vector<128x128xf32> -> vector<128x128xf32>
    %43 = vector.shape_cast %42 : vector<128x128xf32> to vector<8x16x128xf32>
    %44 = vector.extract_strided_slice %43 {offsets = [0, 0, 0], sizes = [8, 8, 128], strides = [1, 1, 1]} : vector<8x16x128xf32> to vector<8x8x128xf32>
    %45 = arith.addf %37, %44 : vector<8x8x128xf32>
    %46 = vector.extract_strided_slice %12 {offsets = [1, 0, 0], sizes = [8, 16, 128], strides = [1, 1, 1]} : vector<10x16x128xbf16> to vector<8x16x128xbf16>
    %47 = vector.shape_cast %46 : vector<8x16x128xbf16> to vector<128x128xbf16>
    %c4 = arith.constant 4 : index
    %c0_27 = arith.constant 0 : index
    %c0_28 = arith.constant 0 : index
    %48 = vector.load %arg6[%c4, %c0_27, %c0_28] : memref<9x128x128xbf16, #tpu.memory_space<vmem>>, vector<1x128x128xbf16>
    %49 = vector.shape_cast %48 : vector<1x128x128xbf16> to vector<128x128xbf16>
    %cst_29 = arith.constant dense<0.000000e+00> : vector<128x128xf32>
    %50 = tpu.matmul %47, %49, %cst_29 {dimension_numbers = #tpu.dot_dimension_numbers<[1], [0], [0], [1], [0, 0, 1, 1], [], []>} : vector<128x128xbf16>, vector<128x128xbf16>, vector<128x128xf32> -> vector<128x128xf32>
    %51 = vector.shape_cast %50 : vector<128x128xf32> to vector<8x16x128xf32>
    %52 = vector.extract_strided_slice %51 {offsets = [0, 1, 0], sizes = [8, 8, 128], strides = [1, 1, 1]} : vector<8x16x128xf32> to vector<8x8x128xf32>
    %53 = arith.addf %45, %52 : vector<8x8x128xf32>
    %54 = vector.extract_strided_slice %12 {offsets = [1, 0, 0], sizes = [8, 16, 128], strides = [1, 1, 1]} : vector<10x16x128xbf16> to vector<8x16x128xbf16>
    %55 = vector.shape_cast %54 : vector<8x16x128xbf16> to vector<128x128xbf16>
    %c5 = arith.constant 5 : index
    %c0_30 = arith.constant 0 : index
    %c0_31 = arith.constant 0 : index
    %56 = vector.load %arg6[%c5, %c0_30, %c0_31] : memref<9x128x128xbf16, #tpu.memory_space<vmem>>, vector<1x128x128xbf16>
    %57 = vector.shape_cast %56 : vector<1x128x128xbf16> to vector<128x128xbf16>
    %cst_32 = arith.constant dense<0.000000e+00> : vector<128x128xf32>
    %58 = tpu.matmul %55, %57, %cst_32 {dimension_numbers = #tpu.dot_dimension_numbers<[1], [0], [0], [1], [0, 0, 1, 1], [], []>} : vector<128x128xbf16>, vector<128x128xbf16>, vector<128x128xf32> -> vector<128x128xf32>
    %59 = vector.shape_cast %58 : vector<128x128xf32> to vector<8x16x128xf32>
    %60 = vector.extract_strided_slice %59 {offsets = [0, 2, 0], sizes = [8, 8, 128], strides = [1, 1, 1]} : vector<8x16x128xf32> to vector<8x8x128xf32>
    %61 = arith.addf %53, %60 : vector<8x8x128xf32>
    %62 = vector.extract_strided_slice %12 {offsets = [2, 0, 0], sizes = [8, 16, 128], strides = [1, 1, 1]} : vector<10x16x128xbf16> to vector<8x16x128xbf16>
    %63 = vector.shape_cast %62 : vector<8x16x128xbf16> to vector<128x128xbf16>
    %c6 = arith.constant 6 : index
    %c0_33 = arith.constant 0 : index
    %c0_34 = arith.constant 0 : index
    %64 = vector.load %arg6[%c6, %c0_33, %c0_34] : memref<9x128x128xbf16, #tpu.memory_space<vmem>>, vector<1x128x128xbf16>
    %65 = vector.shape_cast %64 : vector<1x128x128xbf16> to vector<128x128xbf16>
    %cst_35 = arith.constant dense<0.000000e+00> : vector<128x128xf32>
    %66 = tpu.matmul %63, %65, %cst_35 {dimension_numbers = #tpu.dot_dimension_numbers<[1], [0], [0], [1], [0, 0, 1, 1], [], []>} : vector<128x128xbf16>, vector<128x128xbf16>, vector<128x128xf32> -> vector<128x128xf32>
    %67 = vector.shape_cast %66 : vector<128x128xf32> to vector<8x16x128xf32>
    %68 = vector.extract_strided_slice %67 {offsets = [0, 0, 0], sizes = [8, 8, 128], strides = [1, 1, 1]} : vector<8x16x128xf32> to vector<8x8x128xf32>
    %69 = arith.addf %61, %68 : vector<8x8x128xf32>
    %70 = vector.extract_strided_slice %12 {offsets = [2, 0, 0], sizes = [8, 16, 128], strides = [1, 1, 1]} : vector<10x16x128xbf16> to vector<8x16x128xbf16>
    %71 = vector.shape_cast %70 : vector<8x16x128xbf16> to vector<128x128xbf16>
    %c7 = arith.constant 7 : index
    %c0_36 = arith.constant 0 : index
    %c0_37 = arith.constant 0 : index
    %72 = vector.load %arg6[%c7, %c0_36, %c0_37] : memref<9x128x128xbf16, #tpu.memory_space<vmem>>, vector<1x128x128xbf16>
    %73 = vector.shape_cast %72 : vector<1x128x128xbf16> to vector<128x128xbf16>
    %cst_38 = arith.constant dense<0.000000e+00> : vector<128x128xf32>
    %74 = tpu.matmul %71, %73, %cst_38 {dimension_numbers = #tpu.dot_dimension_numbers<[1], [0], [0], [1], [0, 0, 1, 1], [], []>} : vector<128x128xbf16>, vector<128x128xbf16>, vector<128x128xf32> -> vector<128x128xf32>
    %75 = vector.shape_cast %74 : vector<128x128xf32> to vector<8x16x128xf32>
    %76 = vector.extract_strided_slice %75 {offsets = [0, 1, 0], sizes = [8, 8, 128], strides = [1, 1, 1]} : vector<8x16x128xf32> to vector<8x8x128xf32>
    %77 = arith.addf %69, %76 : vector<8x8x128xf32>
    %78 = vector.extract_strided_slice %12 {offsets = [2, 0, 0], sizes = [8, 16, 128], strides = [1, 1, 1]} : vector<10x16x128xbf16> to vector<8x16x128xbf16>
    %79 = vector.shape_cast %78 : vector<8x16x128xbf16> to vector<128x128xbf16>
    %c8 = arith.constant 8 : index
    %c0_39 = arith.constant 0 : index
    %c0_40 = arith.constant 0 : index
    %80 = vector.load %arg6[%c8, %c0_39, %c0_40] : memref<9x128x128xbf16, #tpu.memory_space<vmem>>, vector<1x128x128xbf16>
    %81 = vector.shape_cast %80 : vector<1x128x128xbf16> to vector<128x128xbf16>
    %cst_41 = arith.constant dense<0.000000e+00> : vector<128x128xf32>
    %82 = tpu.matmul %79, %81, %cst_41 {dimension_numbers = #tpu.dot_dimension_numbers<[1], [0], [0], [1], [0, 0, 1, 1], [], []>} : vector<128x128xbf16>, vector<128x128xbf16>, vector<128x128xf32> -> vector<128x128xf32>
    %83 = vector.shape_cast %82 : vector<128x128xf32> to vector<8x16x128xf32>
    %84 = vector.extract_strided_slice %83 {offsets = [0, 2, 0], sizes = [8, 8, 128], strides = [1, 1, 1]} : vector<8x16x128xf32> to vector<8x8x128xf32>
    %85 = arith.addf %77, %84 : vector<8x8x128xf32>
    %c0_42 = arith.constant 0 : index
    %c0_43 = arith.constant 0 : index
    %c0_44 = arith.constant 0 : index
    %c0_45 = arith.constant 0 : index
    %86 = vector.load %arg7[%c0_42, %c0_43, %c0_44, %c0_45] : memref<1x8x8x4xbf16, #tpu.memory_space<vmem>>, vector<1x8x8x4xbf16>
    %87 = vector.shape_cast %86 : vector<1x8x8x4xbf16> to vector<64x4xbf16>
    %c0_46 = arith.constant 0 : index
    %c0_47 = arith.constant 0 : index
    %88 = vector.load %arg8[%c0_46, %c0_47] : memref<4x128xbf16, #tpu.memory_space<vmem>>, vector<4x128xbf16>
    %cst_48 = arith.constant dense<0.000000e+00> : vector<64x128xf32>
    %89 = tpu.matmul %87, %88, %cst_48 {dimension_numbers = #tpu.dot_dimension_numbers<[1], [0], [0], [1], [0, 0, 1, 1], [], []>} : vector<64x4xbf16>, vector<4x128xbf16>, vector<64x128xf32> -> vector<64x128xf32>
    %90 = vector.shape_cast %89 : vector<64x128xf32> to vector<8x8x128xf32>
    %91 = arith.addf %85, %90 : vector<8x8x128xf32>
    %cst_49 = arith.constant 0.000000e+00 : f32
    %92 = vector.broadcast %cst_49 : f32 to vector<8x8x128xf32>
    %93 = arith.cmpf oge, %91, %92 : vector<8x8x128xf32>
    %cst_50 = arith.constant 2.000000e-01 : f32
    %94 = vector.broadcast %cst_50 : f32 to vector<8x8x128xf32>
    %95 = arith.mulf %94, %91 : vector<8x8x128xf32>
    %96 = arith.select %93, %91, %95 : vector<8x8x128xi1>, vector<8x8x128xf32>
    %97 = arith.truncf %96 : vector<8x8x128xf32> to vector<8x8x128xbf16>
    %98 = vector.shape_cast %97 : vector<8x8x128xbf16> to vector<1x8x8x128xbf16>
    %c0_51 = arith.constant 0 : index
    %c0_52 = arith.constant 0 : index
    %c0_53 = arith.constant 0 : index
    %c0_54 = arith.constant 0 : index
    %99 = vector.load %arg9[%c0_51, %c0_52, %c0_53, %c0_54] : memref<1x8x8x128xbf16, #tpu.memory_space<vmem>>, vector<1x8x8x128xbf16>
    tpu.vector_store %arg9[%c0_51, %c0_52, %c0_53, %c0_54], %98 {strides = array<i32>} : memref<1x8x8x128xbf16, #tpu.memory_space<vmem>>, vector<1x8x8x128xbf16>,
    return
  }
  func.func @transform_0(%arg0: i32, %arg1: i32, %arg2: i32) -> (i32, i32, i32, i32) {
    %c8_i32 = arith.constant 8 : i32
    %0 = arith.muli %arg2, %c8_i32 : i32
    %c1_i32 = arith.constant 1 : i32
    %1 = arith.subi %0, %c1_i32 : i32
    %c0_i32 = arith.constant 0 : i32
    %2 = arith.maxsi %1, %c0_i32 : i32
    %c0_i32_0 = arith.constant 0 : i32
    %c0_i32_1 = arith.constant 0 : i32
    %c0_i32_2 = arith.constant 0 : i32
    return %arg1, %2, %c0_i32_0, %c0_i32_1 : i32, i32, i32, i32
  }
  func.func @transform_1(%arg0: i32, %arg1: i32, %arg2: i32) -> (i32, i32, i32, i32) {
    %c0_i32 = arith.constant 0 : i32
    %c0_i32_0 = arith.constant 0 : i32
    %c0_i32_1 = arith.constant 0 : i32
    return %arg1, %arg2, %c0_i32, %c0_i32_0 : i32, i32, i32, i32
  }
  func.func @transform_2(%arg0: i32, %arg1: i32, %arg2: i32) -> (i32, i32, i32, i32) {
    %c8_i32 = arith.constant 8 : i32
    %0 = arith.muli %arg2, %c8_i32 : i32
    %c8_i32_0 = arith.constant 8 : i32
    %1 = arith.addi %0, %c8_i32_0 : i32
    %c7_i32 = arith.constant 7 : i32
    %2 = arith.minsi %1, %c7_i32 : i32
    %c0_i32 = arith.constant 0 : i32
    %c0_i32_1 = arith.constant 0 : i32
    %c0_i32_2 = arith.constant 0 : i32
    return %arg1, %2, %c0_i32, %c0_i32_1 : i32, i32, i32, i32
  }
  func.func @transform_3(%arg0: i32, %arg1: i32, %arg2: i32) -> (i32, i32, i32) {
    %c0_i32 = arith.constant 0 : i32
    %c0_i32_0 = arith.constant 0 : i32
    %c0_i32_1 = arith.constant 0 : i32
    return %c0_i32, %c0_i32_0, %arg0 : i32, i32, i32
  }
  func.func @transform_4(%arg0: i32, %arg1: i32, %arg2: i32) -> (i32, i32, i32, i32) {
    %c0_i32 = arith.constant 0 : i32
    %c0_i32_0 = arith.constant 0 : i32
    %c0_i32_1 = arith.constant 0 : i32
    return %arg1, %arg2, %c0_i32, %c0_i32_0 : i32, i32, i32, i32
  }
  func.func @transform_5(%arg0: i32, %arg1: i32, %arg2: i32) -> (i32, i32) {
    %c0_i32 = arith.constant 0 : i32
    %c0_i32_0 = arith.constant 0 : i32
    return %c0_i32, %arg0 : i32, i32
  }
  func.func @transform_6(%arg0: i32, %arg1: i32, %arg2: i32) -> (i32, i32, i32, i32) {
    %c0_i32 = arith.constant 0 : i32
    %c0_i32_0 = arith.constant 0 : i32
    return %arg1, %arg2, %c0_i32, %arg0 : i32, i32, i32, i32
  }
}

</mosaic_0001>

<bundles_post_ra>
// kernel: custom-call.2
= control target key start
LH: loop header
LB: loop body
LE: loop exit
PB: predicated region body
PF: predicated region fallthrough
CT: control target
= control target key end

     0   :  { %s6_s0 = inlined_call_operand.vmem [shape: f32[8], index: 0, kind: output, shape index: {}]  }

// kernel: resblock_d_forward.2
= control target key start
LH: loop header
LB: loop body
LE: loop exit
PB: predicated region body
PF: predicated region fallthrough
CT: control target
= control target key end

     0   :  { %s2144_s15 = smov 0   ;;  %s2146_s16 = smov 0   ;;  %s2556_s0 = inlined_call_operand.vmem [shape: bf16[2,9,64,4], index: 0, kind: input, shape index: {}, may-alias: {0,1,2}]   ;;  %s2557_s1 = inlined_call_operand.vmem [shape: bf16[2,9,64,4], index: 1, kind: input, shape index: {}, may-alias: {0,1,2}]   ;;  %s2558_s2 = inlined_call_operand.vmem [shape: bf16[2,9,64,4], index: 2, kind: input, shape index: {}, may-alias: {0,1,2}]   ;;  %s2559_s3 = inlined_call_operand.vmem [shape: bf16[9,4,128], index: 3, kind: input, shape index: {}]   ;;  %s2560_s4 = inlined_call_operand.vmem [shape: bf16[2,8,16,128], index: 4, kind: output, shape index: {}]  }
   0x1   :  { %s2148_s17 = smov 0  }
   0x2 LB: > { %s29_s0 = sadd.s32 1, %s2113_s16  ;;  %p1805_p0 = scmp.ge.s32.totalorder %s2117_s17, 1  ;;  %s2117_s17 = sphi %s2148_s17, %s14_s17   ;;  %s2113_s16 = sphi %s2146_s16, %s2566_s16   ;;  %s2109_s15 = sphi %s2144_s15, %s2565_s15  }
   0x3   : > { %p31_p1 = scmp.ge.s32.totalorder %s29_s0, 2  ;;  %p276_p2 = scmp.lt.s32.totalorder %s2117_s17, 3 }
   0x5   : > { %s2568_s0 = smov (%p31_p1, %s29_s0), 0  ;;  %p277_p3 = pnand %p1805_p0, %p276_p2 }
   0x6   : > { %p373_p4 = scmp.lt.s32.totalorder (!%p277_p3), %s2109_s15, 1 }
   0x7   : > { %280 = sbr.rel (%p277_p3) target bundleno = 460 (0x1cc), region = 36 }
   0xc   : > { %v492_v0 = vld [vmem:[%s2559_s3] sm:$0x3]  ;;  %vm558_vm0 = vcmask 1041408   ;;  %v1850_v2 = vld [vmem:[%s2559_s3 + $0x2] sm:$0x3]  ;;  %s2570_s15 = smov (!%p373_p4, %s2109_s15), 1 }
   0xd   : > { %v560_v1 = vsel %vm558_vm0, %v492_v0, 0  ;;  %v1941_v3 = vld [vmem:[%s2559_s3 + $0x8] sm:$0x3]  ;;  %v678_v4 = vsel %vm558_vm0, %v1850_v2, 0  ;;  %v1891_v6 = vld [vmem:[%s2559_s3 + $0x4] sm:$0x3] }
   0xe   : > { %569 = vmatpush.bf16.msra.mxu0 %v560_v1  ;;  %2065 = vmatpush.bf16.msra.mxu1 %v560_v1  ;;  %v1025_v5 = vsel %vm558_vm0, %v1941_v3, 0  ;;  %v732_v7 = vsel %vm558_vm0, %v1891_v6, 0  ;;  %v1900_v8 = vld [vmem:[%s2559_s3 + $0x6] sm:$0x3]  ;;  %s2068_s28 = smul.u32 288, %s2570_s15  ;;  %vm533_vm1 = vcmask 31744  }
   0xf   : > { %2066 = vmatpush.bf16.msra.mxu2 %v560_v1  ;;  %2067 = vmatpush.bf16.msra.mxu3 %v560_v1  ;;  %v907_v9 = vsel %vm558_vm0, %v1900_v8, 0  ;;  %v1982_v14 = vld [vmem:[%s2559_s3 + $0xa] sm:$0x3]  ;;  %v2017_v16 = vld [vmem:[%s2559_s3 + $0x10] sm:$0x3]  ;;  %vm799_vm2 = vcmask 1046528  }
  0x10   : > { %s2190_s5 = scalar_lea.vmem %s2557_s1, %s2068_s28  ;;  %v1079_v15 = vsel %vm558_vm0, %v1982_v14, 0  ;;  %v1991_v17 = vld [vmem:[%s2559_s3 + $0xc] sm:$0x3]  ;;  %v1313_v18 = vsel %vm558_vm0, %v2017_v16, 0  ;;  %v2004_v20 = vld [vmem:[%s2559_s3 + $0xe] sm:$0x3] }
  0x11   : > { %v2033_v10 = vld [vmem:[%s2190_s5] sm:$0xff]  ;;  %v1197_v19 = vsel %vm558_vm0, %v1991_v17, 0  ;;  %v1259_v21 = vsel %vm558_vm0, %v2004_v20, 0  ;;  %v2034_v26 = vld [vmem:[%s2190_s5 + $0x8] sm:$0xff]  ;;  %v2036_v27 = vld [vmem:[%s2190_s5 + $0x18] sm:$0xff]  ;;  %s2029_s14 = sadd.s32 256, %s2068_s28 }
  0x12   : > { %687 = vmatpush.bf16.msrb.mxu1 %v678_v4  ;;  %1034 = vmatpush.bf16.msrb.mxu0 %v1025_v5  ;;  %v2194_v11 = vld [vmem:[%s2190_s5 + $0x40] sm:$0xff]  ;;  %v2248_v28 = vld [vmem:[%s2190_s5 + $0x10] sm:$0xff]  ;;  %v2256_v29 = vld [vmem:[%s2190_s5 + $0x28] sm:$0xff]  ;;  %s400_s20 = scalar_lea.vmem %s2558_s2, %s2029_s14  ;;  %vm1540_vm4 = vcmask 1040384   ;;  %vm1541_vm5 = vsmask.f32 256 }
  0x13   : > { %741 = vmatpush.bf16.msrb.mxu2 %v732_v7  ;;  %916 = vmatpush.bf16.msrb.mxu3 %v907_v9  ;;  %v2197_v12 = vld [vmem:[%s2190_s5 + $0x80] sm:$0xff]  ;;  %v2040_v30 = vld [vmem:[%s2190_s5 + $0x38] sm:$0xff]  ;;  %v2260_v31 = vld [vmem:[%s2190_s5 + $0x30] sm:$0xff]  ;;  %vm1551_vm6 = vcmask 1044480   ;;  %vm1552_vm7 = vsmask.f32 4352 }
  0x14   : > { %v2200_v13 = vld [vmem:[%s2190_s5 + $0xc0] sm:$0xff]  ;;  %1842 = vmatmul.msk.bf16.vlgmr.msra.gmra.mxu0 %vm533_vm1, %v2033_v10  ;;  %1844 = vmatmul.msk.bf16.vlgmr.msra.gmra.mxu1 %vm533_vm1, %v2194_v11  ;;  %v2270_v32 = vld [vmem:[%s2190_s5 + $0x48] sm:$0xff]  ;;  %v2044_v33 = vld [vmem:[%s2190_s5 + $0x58] sm:$0xff]  ;;  %s2030_s21 = sshll.u32 %s2570_s15, 6 }
  0x15   : > { %1846 = vmatmul.msk.bf16.vlgmr.msra.gmra.mxu2 %vm533_vm1, %v2197_v12  ;;  %1848 = vmatmul.msk.bf16.vlgmr.msra.gmra.mxu3 %vm533_vm1, %v2200_v13  ;;  %v2226_v22 = vld [vmem:[%s2190_s5 + $0x20] sm:$0xff]  ;;  %v2274_v34 = vld [vmem:[%s2190_s5 + $0x50] sm:$0xff]  ;;  %v2284_v35 = vld [vmem:[%s2190_s5 + $0x68] sm:$0xff]  ;;  %s2483_s24 = scalar_lea.vmem %s2560_s4, %s2030_s21 }
  0x16   : > { %1088 = vmatpush.bf16.msra.mxu1 %v1079_v15  ;;  %1322 = vmatpush.bf16.msra.mxu0 %v1313_v18  ;;  %v2229_v23 = vld [vmem:[%s2190_s5 + $0x60] sm:$0xff]  ;;  %v2048_v36 = vld [vmem:[%s2190_s5 + $0x78] sm:$0xff]  ;;  %v2288_v37 = vld [vmem:[%s2190_s5 + $0x70] sm:$0xff] }
  0x17   : > { %1206 = vmatpush.bf16.msra.mxu2 %v1197_v19  ;;  %1268 = vmatpush.bf16.msra.mxu3 %v1259_v21  ;;  %v2232_v24 = vld [vmem:[%s2190_s5 + $0xa0] sm:$0xff]  ;;  %v2298_v38 = vld [vmem:[%s2190_s5 + $0x88] sm:$0xff]  ;;  %v2052_v39 = vld [vmem:[%s2190_s5 + $0x98] sm:$0xff] }
  0x18   : > { %v2235_v25 = vld [vmem:[%s2190_s5 + $0xe0] sm:$0xff]  ;;  %v2302_v40 = vld [vmem:[%s2190_s5 + $0x90] sm:$0xff]  ;;  %v2312_v41 = vld [vmem:[%s2190_s5 + $0xa8] sm:$0xff] }
  0x19   : > { %v2056_v42 = vld [vmem:[%s2190_s5 + $0xb8] sm:$0xff]  ;;  %v2316_v43 = vld [vmem:[%s2190_s5 + $0xb0] sm:$0xff]  ;;  %v2326_v44 = vld [vmem:[%s2190_s5 + $0xc8] sm:$0xff] }
  0x1a   : > { %v2060_v45 = vld [vmem:[%s2190_s5 + $0xd8] sm:$0xff]  ;;  %v2332_v48 = vld [vmem:[%s2190_s5 + $0xd0] sm:$0xff]  ;;  %v2346_v55 = vld [vmem:[%s2190_s5 + $0xe8] sm:$0xff] }
  0x1b   : > { %v2064_v56 = vld [vmem:[%s2190_s5 + $0xf8] sm:$0xff]  ;;  %v2352_v59 = vld [vmem:[%s2190_s5 + $0xf0] sm:$0xff]  ;;  %vm2466_vm8 = vmand %vm1540_vm4, %vm1541_vm5 }
  0x1c   : > { %vm2470_vm9 = vmand %vm1551_vm6, %vm1552_vm7 }
  0x24   : > { %1843 = vmatmul.msk.bf16.gmra.mxu0 %vm533_vm1, %v2226_v22  ;;  %1845 = vmatmul.msk.bf16.gmra.mxu1 %vm533_vm1, %v2229_v23 }
  0x25   : > { %1847 = vmatmul.msk.bf16.gmra.mxu2 %vm533_vm1, %v2232_v24  ;;  %1849 = vmatmul.msk.bf16.gmra.mxu3 %vm533_vm1, %v2235_v25 }
  0x34   : > { %1883 = vmatmul.msk.bf16.vlgmr.msrb.gmra.mxu1 %vm533_vm1, %v2034_v26  ;;  %1974 = vmatmul.msk.bf16.vlgmr.msrb.gmra.mxu0 %vm533_vm1, %v2036_v27 }
  0x35   : > { %1892 = vmatmul.msk.bf16.vlgmr.msrb.gmra.mxu2 %vm533_vm1, %v2033_v10  ;;  %1933 = vmatmul.msk.bf16.vlgmr.msrb.gmra.mxu3 %vm533_vm1, %v2248_v28 }
  0x44   : > { %1884 = vmatmul.msk.bf16.gmra.mxu1 %vm533_vm1, %v2256_v29  ;;  %1975 = vmatmul.msk.bf16.gmra.mxu0 %vm533_vm1, %v2040_v30 }
  0x45   : > { %1893 = vmatmul.msk.bf16.gmra.mxu2 %vm533_vm1, %v2226_v22  ;;  %1934 = vmatmul.msk.bf16.gmra.mxu3 %vm533_vm1, %v2260_v31 }
  0x54   : > { %1885 = vmatmul.msk.bf16.gmra.mxu1 %vm533_vm1, %v2270_v32  ;;  %1976 = vmatmul.msk.bf16.gmra.mxu0 %vm533_vm1, %v2044_v33 }
  0x55   : > { %1894 = vmatmul.msk.bf16.gmra.mxu2 %vm533_vm1, %v2194_v11  ;;  %1935 = vmatmul.msk.bf16.gmra.mxu3 %vm533_vm1, %v2274_v34 }
  0x64   : > { %1886 = vmatmul.msk.bf16.gmra.mxu1 %vm533_vm1, %v2284_v35  ;;  %1977 = vmatmul.msk.bf16.gmra.mxu0 %vm533_vm1, %v2048_v36 }
  0x65   : > { %1895 = vmatmul.msk.bf16.gmra.mxu2 %vm533_vm1, %v2229_v23  ;;  %1936 = vmatmul.msk.bf16.gmra.mxu3 %vm533_vm1, %v2288_v37 }
  0x74   : > { %1887 = vmatmul.msk.bf16.gmra.mxu1 %vm533_vm1, %v2298_v38  ;;  %1978 = vmatmul.msk.bf16.gmra.mxu0 %vm533_vm1, %v2052_v39 }
  0x75   : > { %1896 = vmatmul.msk.bf16.gmra.mxu2 %vm533_vm1, %v2197_v12  ;;  %1937 = vmatmul.msk.bf16.gmra.mxu3 %vm533_vm1, %v2302_v40 }
  0x84   : > { %1888 = vmatmul.msk.bf16.gmra.mxu1 %vm533_vm1, %v2312_v41  ;;  %1979 = vmatmul.msk.bf16.gmra.mxu0 %vm533_vm1, %v2056_v42 }
  0x85   : > { %1897 = vmatmul.msk.bf16.gmra.mxu2 %vm533_vm1, %v2232_v24  ;;  %1938 = vmatmul.msk.bf16.gmra.mxu3 %vm533_vm1, %v2316_v43 }
  0x91   : > { %v571_v46 = vpop.f32.mrf.mxu0  ;;  %v2329_v47 = vpop.f32.mrf.mxu1 }
  0x94   : > { %1889 = vmatmul.msk.bf16.gmra.mxu1 %vm533_vm1, %v2326_v44  ;;  %1980 = vmatmul.msk.bf16.gmra.mxu0 %vm533_vm1, %v2060_v45 }
  0x95   : > { %1898 = vmatmul.msk.bf16.gmra.mxu2 %vm533_vm1, %v2200_v13  ;;  %1939 = vmatmul.msk.bf16.gmra.mxu3 %vm533_vm1, %v2332_v48 }
  0x98   : > { %v2341_v49 = vpop.f32.mrf.mxu2  ;;  %v2343_v50 = vpop.f32.mrf.mxu3 }
  0x99   : > { %v573_v51 = vpop.f32.mrf.mxu0  ;;  %v581_v52 = vpop.f32.mrf.mxu1 }
  0xa0   : > { %v589_v53 = vpop.f32.mrf.mxu2  ;;  %v597_v54 = vpop.f32.mrf.mxu3 }
  0xa1   : > { %v575_v57 = vpop.f32.mrf.mxu0  ;;  %v2349_v58 = vpop.f32.mrf.mxu1 }
  0xa4   : > { %1890 = vmatmul.msk.bf16.gmra.mxu1 %vm533_vm1, %v2346_v55  ;;  %1981 = vmatmul.msk.bf16.gmra.mxu0 %vm533_vm1, %v2064_v56 }
  0xa5   : > { %1899 = vmatmul.msk.bf16.gmra.mxu2 %vm533_vm1, %v2235_v25  ;;  %1940 = vmatmul.msk.bf16.gmra.mxu3 %vm533_vm1, %v2352_v59 }
  0xa8   : > { %v2361_v60 = vpop.f32.mrf.mxu2  ;;  %v2363_v61 = vpop.f32.mrf.mxu3 }
  0xa9   : > { %v577_v62 = vpop.f32.mrf.mxu0  ;;  %v585_v63 = vpop.f32.mrf.mxu1 }
  0xb0   : > { %v593_v0 = vpop.f32.mrf.mxu2  ;;  %v601_v1 = vpop.f32.mrf.mxu3 }
  0xb1   : > { %v689_v2 = vpop.f32.mrf.mxu1  ;;  %v1036_v3 = vpop.f32.mrf.mxu0 }
  0xb2   : > { %v721_v4 = vadd.f32 %v689_v2, %v571_v46 }
  0xb4   : > { %1983 = vmatmul.msk.bf16.vlgmr.msra.gmra.mxu1 %vm533_vm1, %v2248_v28  ;;  %2018 = vmatmul.msk.bf16.vlgmr.msra.gmra.mxu0 %vm533_vm1, %v2226_v22 }
  0xb5   : > { %1996 = vmatmul.msk.bf16.vlgmr.msra.gmra.mxu2 %vm533_vm1, %v2226_v22  ;;  %2009 = vmatmul.msk.bf16.vlgmr.msra.gmra.mxu3 %vm533_vm1, %v2256_v29 }
  0xb8   : > { %v743_v5 = vpop.f32.mrf.mxu2  ;;  %v918_v6 = vpop.f32.mrf.mxu3 }
  0xb9   : > { %v691_v7 = vpop.f32.mrf.mxu1  ;;  %v1038_v8 = vpop.f32.mrf.mxu0  ;;  %v800_v9 = vrot.slane %v743_v5, 1 }
  0xc0   : > { %v745_v10 = vpop.f32.mrf.mxu2  ;;  %v920_v14 = vpop.f32.mrf.mxu3 }
  0xc1   : > { %v801_v15 = vrot.slane %v745_v10, 1  ;;  %v693_v16 = vpop.f32.mrf.mxu1  ;;  %v1040_v17 = vpop.f32.mrf.mxu0 }
  0xc2   : > { %v722_v18 = vadd.f32 %v693_v16, %v575_v57 }
  0xc3   : > { %v802_v19 = vsel %vm799_vm2, %v800_v9, %v801_v15 }
  0xc4   : > { %v832_v20 = vadd.f32 %v802_v19, %v721_v4  ;;  %1984 = vmatmul.msk.bf16.gmra.mxu1 %vm533_vm1, %v2260_v31  ;;  %2019 = vmatmul.msk.bf16.gmra.mxu0 %vm533_vm1, %v2194_v11 }
  0xc5   : > { %1997 = vmatmul.msk.bf16.gmra.mxu2 %vm533_vm1, %v2194_v11  ;;  %2010 = vmatmul.msk.bf16.gmra.mxu3 %vm533_vm1, %v2270_v32 }
  0xc6   : > { %v950_v21 = vadd.f32 %v918_v6, %v832_v20 }
  0xc8   : > { %v748_v22 = vpop.f32.mrf.mxu2  ;;  %v922_v26 = vpop.f32.mrf.mxu3  ;;  %v2382_v27 = vadd.f32 %v1036_v3, %v950_v21 }
  0xc9   : > { %v695_v28 = vpop.f32.mrf.mxu1  ;;  %v1042_v29 = vpop.f32.mrf.mxu0  ;;  %v803_v30 = vrot.slane %v748_v22, 1 }
  0xd0   : > { %v750_v33 = vpop.f32.mrf.mxu2  ;;  %v924_v36 = vpop.f32.mrf.mxu3 }
  0xd1   : > { %v804_v31 = vrot.slane %v750_v33, 1  ;;  %v697_v39 = vpop.f32.mrf.mxu1  ;;  %v1044_v42 = vpop.f32.mrf.mxu0 }
  0xd2   : > { %v723_v45 = vadd.f32 %v697_v39, %v2329_v47 }
  0xd3   : > { %v805_v11 = vsel %vm799_vm2, %v803_v30, %v804_v31 }
  0xd4   : > { %v833_v46 = vadd.f32 %v805_v11, %v722_v18  ;;  %1985 = vmatmul.msk.bf16.gmra.mxu1 %vm533_vm1, %v2274_v34  ;;  %2020 = vmatmul.msk.bf16.gmra.mxu0 %vm533_vm1, %v2229_v23 }
  0xd5   : > { %1998 = vmatmul.msk.bf16.gmra.mxu2 %vm533_vm1, %v2229_v23  ;;  %2011 = vmatmul.msk.bf16.gmra.mxu3 %vm533_vm1, %v2284_v35 }
  0xd6   : > { %v951_v32 = vadd.f32 %v922_v26, %v833_v46 }
  0xd8   : > { %v753_v51 = vpop.f32.mrf.mxu2  ;;  %v926_v52 = vpop.f32.mrf.mxu3  ;;  %v2394_v53 = vadd.f32 %v1040_v17, %v951_v32 }
  0xd9   : > { %v699_v47 = vpop.f32.mrf.mxu1  ;;  %v1046_v54 = vpop.f32.mrf.mxu0  ;;  %v806_v56 = vrot.slane %v753_v51, 1 }
  0xe0   : > { %v755_v57 = vpop.f32.mrf.mxu2  ;;  %v928_v62 = vpop.f32.mrf.mxu3 }
  0xe1   : > { %v807_v34 = vrot.slane %v755_v57, 1  ;;  %v701_v63 = vpop.f32.mrf.mxu1  ;;  %v1048_v0 = vpop.f32.mrf.mxu0 }
  0xe2   : > { %v724_v1 = vadd.f32 %v701_v63, %v2349_v58 }
  0xe3   : > { %v808_v23 = vsel %vm799_vm2, %v806_v56, %v807_v34 }
  0xe4   : > { %v834_v2 = vadd.f32 %v808_v23, %v723_v45  ;;  %1986 = vmatmul.msk.bf16.gmra.mxu1 %vm533_vm1, %v2288_v37  ;;  %2021 = vmatmul.msk.bf16.gmra.mxu0 %vm533_vm1, %v2197_v12  ;;  %v2032_v23 = vld [vmem:[%s400_s20 + $0x8] sm:$0xff] }
  0xe5   : > { %1999 = vmatmul.msk.bf16.gmra.mxu2 %vm533_vm1, %v2197_v12  ;;  %2012 = vmatmul.msk.bf16.gmra.mxu3 %vm533_vm1, %v2298_v38 }
  0xe6   : > { %v952_v35 = vadd.f32 %v926_v52, %v834_v2 }
  0xe8   : > { %v758_v3 = vpop.f32.mrf.mxu2  ;;  %v930_v4 = vpop.f32.mrf.mxu3  ;;  %v2406_v5 = vadd.f32 %v1044_v42, %v952_v35 }
  0xe9   : > { %v703_v58 = vpop.f32.mrf.mxu1  ;;  %v1050_v6 = vpop.f32.mrf.mxu0  ;;  %v809_v7 = vrot.slane %v758_v3, 1 }
  0xf0   : > { %v760_v8 = vpop.f32.mrf.mxu2  ;;  %v932_v9 = vpop.f32.mrf.mxu3 }
  0xf1   : > { %v810_v37 = vrot.slane %v760_v8, 1  ;;  %v705_v10 = vpop.f32.mrf.mxu1  ;;  %v1052_v14 = vpop.f32.mrf.mxu0 }
  0xf2   : > { %v725_v30 = vadd.f32 %v705_v10, %v2341_v49 }
  0xf3   : > { %v811_v15 = vsel %vm799_vm2, %v809_v7, %v810_v37 }
  0xf4   : > { %v835_v16 = vadd.f32 %v811_v15, %v724_v1  ;;  %1987 = vmatmul.msk.bf16.gmra.mxu1 %vm533_vm1, %v2302_v40  ;;  %2022 = vmatmul.msk.bf16.gmra.mxu0 %vm533_vm1, %v2232_v24 }
  0xf5   : > { %2000 = vmatmul.msk.bf16.gmra.mxu2 %vm533_vm1, %v2232_v24  ;;  %2013 = vmatmul.msk.bf16.gmra.mxu3 %vm533_vm1, %v2312_v41 }
  0xf6   : > { %v953_v12 = vadd.f32 %v930_v4, %v835_v16 }
  0xf8   : > { %v763_v38 = vpop.f32.mrf.mxu2  ;;  %v934_v17 = vpop.f32.mrf.mxu3  ;;  %v2417_v18 = vadd.f32 %v1048_v0, %v953_v12 }
  0xf9   : > { %v707_v19 = vpop.f32.mrf.mxu1  ;;  %v1054_v20 = vpop.f32.mrf.mxu0  ;;  %v812_v21 = vrot.slane %v763_v38, 1 }
 0x100   : > { %v765_v22 = vpop.f32.mrf.mxu2  ;;  %v936_v26 = vpop.f32.mrf.mxu3 }
 0x101   : > { %v813_v40 = vrot.slane %v765_v22, 1  ;;  %v709_v28 = vpop.f32.mrf.mxu1  ;;  %v1056_v29 = vpop.f32.mrf.mxu0 }
 0x102   : > { %v726_v52 = vadd.f32 %v709_v28, %v2361_v60 }
 0x103   : > { %v814_v24 = vsel %vm799_vm2, %v812_v21, %v813_v40 }
 0x104   : > { %v836_v33 = vadd.f32 %v814_v24, %v725_v30  ;;  %1988 = vmatmul.msk.bf16.gmra.mxu1 %vm533_vm1, %v2316_v43  ;;  %2023 = vmatmul.msk.bf16.gmra.mxu0 %vm533_vm1, %v2200_v13 }
 0x105   : > { %2001 = vmatmul.msk.bf16.gmra.mxu2 %vm533_vm1, %v2200_v13  ;;  %2014 = vmatmul.msk.bf16.gmra.mxu3 %vm533_vm1, %v2326_v44 }
 0x106   : > { %v954_v41 = vadd.f32 %v934_v17, %v836_v33 }
 0x108   : > { %v768_v36 = vpop.f32.mrf.mxu2  ;;  %v938_v31 = vpop.f32.mrf.mxu3  ;;  %v2429_v39 = vadd.f32 %v1052_v14, %v954_v41 }
 0x109   : > { %v711_v49 = vpop.f32.mrf.mxu1  ;;  %v1058_v42 = vpop.f32.mrf.mxu0  ;;  %v815_v45 = vrot.slane %v768_v36, 1 }
 0x110   : > { %v770_v11 = vpop.f32.mrf.mxu2  ;;  %v940_v46 = vpop.f32.mrf.mxu3 }
 0x111   : > { %v816_v43 = vrot.slane %v770_v11, 1  ;;  %v713_v32 = vpop.f32.mrf.mxu1  ;;  %v1060_v51 = vpop.f32.mrf.mxu0 }
 0x112   : > { %v727_v2 = vadd.f32 %v713_v32, %v2343_v50 }
 0x113   : > { %v817_v13 = vsel %vm799_vm2, %v815_v45, %v816_v43 }
 0x114   : > { %v837_v47 = vadd.f32 %v817_v13, %v726_v52  ;;  %1989 = vmatmul.msk.bf16.gmra.mxu1 %vm533_vm1, %v2332_v48  ;;  %2024 = vmatmul.msk.bf16.gmra.mxu0 %vm533_vm1, %v2235_v25 }
 0x115   : > { %2002 = vmatmul.msk.bf16.gmra.mxu2 %vm533_vm1, %v2235_v25  ;;  %2015 = vmatmul.msk.bf16.gmra.mxu3 %vm533_vm1, %v2346_v55  ;;  %v2031_v25 = vld [vmem:[%s400_s20] sm:$0xff] }
 0x116   : > { %v955_v44 = vadd.f32 %v938_v31, %v837_v47 }
 0x118   : > { %v773_v54 = vpop.f32.mrf.mxu2  ;;  %v942_v56 = vpop.f32.mrf.mxu3  ;;  %v2441_v57 = vadd.f32 %v1056_v29, %v955_v44 }
 0x119   : > { %v715_v60 = vpop.f32.mrf.mxu1  ;;  %v1062_v62 = vpop.f32.mrf.mxu0  ;;  %v818_v48 = vrot.slane %v773_v54, 1 }
 0x120   : > { %v775_v34 = vpop.f32.mrf.mxu2  ;;  %v944_v63 = vpop.f32.mrf.mxu3 }
 0x121   : > { %v819_v0 = vrot.slane %v775_v34, 1  ;;  %v717_v1 = vpop.f32.mrf.mxu1  ;;  %v1064_v55 = vpop.f32.mrf.mxu0 }
 0x123   : > { %v820_v35 = vsel %vm799_vm2, %v818_v48, %v819_v0 }
 0x124   : > { %v838_v3 = vadd.f32 %v820_v35, %v727_v2  ;;  %1990 = vmatmul.msk.bf16.gmra.mxu1 %vm533_vm1, %v2352_v59  ;;  %2025 = vmatmul.msk.bf16.gmra.mxu0 %vm533_vm1, %v2031_v25  ;;  %v728_v59 = vadd.f32 %v717_v1, %v2363_v61 }
 0x125   : > { %2003 = vmatmul.msk.bf16.gmra.mxu2 %vm533_vm1, %v2031_v25  ;;  %2016 = vmatmul.msk.bf16.gmra.mxu3 %vm533_vm1, %v2032_v23 }
 0x126   : > { %v956_v4 = vadd.f32 %v942_v56, %v838_v3 }
 0x128   : > { %v778_v58 = vpop.f32.mrf.mxu2  ;;  %v946_v6 = vpop.f32.mrf.mxu3  ;;  %v2455_v7 = vadd.f32 %v1060_v51, %v956_v4 }
 0x129   : > { %v719_v8 = vpop.f32.mrf.mxu1  ;;  %v1066_v9 = vpop.f32.mrf.mxu0  ;;  %v821_v50 = vrot.slane %v778_v58, 1 }
 0x130   : > { %v780_v37 = vpop.f32.mrf.mxu2  ;;  %v948_v10 = vpop.f32.mrf.mxu3 }
 0x131   : > { %v822_v14 = vrot.slane %v780_v37, 1  ;;  %v1090_v15 = vpop.f32.mrf.mxu1  ;;  %v1324_v16 = vpop.f32.mrf.mxu0 }
 0x132   : > { %v1146_v40 = vrot.slane %v1090_v15, 1  ;;  %v1380_v41 = vrot.slane %v1324_v16, 1 }
 0x133   : > { %v823_v12 = vsel %vm799_vm2, %v821_v50, %v822_v14 }
 0x134   : > { %v839_v38 = vadd.f32 %v823_v12, %v728_v59 }
 0x136   : > { %v957_v17 = vadd.f32 %v946_v6, %v839_v38 }
 0x138   : > { %v1208_v19 = vpop.f32.mrf.mxu2  ;;  %v1270_v20 = vpop.f32.mrf.mxu3  ;;  %v2459_v21 = vadd.f32 %v1064_v55, %v957_v17 }
 0x139   : > { %v1092_v22 = vpop.f32.mrf.mxu1  ;;  %v1326_v26 = vpop.f32.mrf.mxu0 }
 0x13a   : > { %v1147_v28 = vrot.slane %v1092_v22, 1  ;;  %v1381_v24 = vrot.slane %v1326_v26, 1 }
 0x13c   : > { %v1148_v29 = vsel %vm799_vm2, %v1146_v40, %v1147_v28  ;;  %v1382_v45 = vsel %vm799_vm2, %v1380_v41, %v1381_v24 }
 0x13d   : > { %v1178_v30 = vadd.f32 %v1148_v29, %v2382_v27 }
 0x13f   : > { %v1240_v33 = vadd.f32 %v1208_v19, %v1178_v30 }
 0x140   : > { %v1210_v61 = vpop.f32.mrf.mxu2  ;;  %v1272_v36 = vpop.f32.mrf.mxu3 }
 0x141   : > { %v1302_v31 = vadd.f32 %v1270_v20, %v1240_v33  ;;  %v1095_v49 = vpop.f32.mrf.mxu1  ;;  %v1329_v42 = vpop.f32.mrf.mxu0 }
 0x142   : > { %v1149_v44 = vrot.slane %v1095_v49, 1  ;;  %v1383_v1 = vrot.slane %v1329_v42, 1 }
 0x143   : > { %v1412_v11 = vadd.f32 %v1382_v45, %v1302_v31 }
 0x145   : > { %vm1420_vm3 = vcmp.ge.f32.partialorder %v1412_v11, 0.0  ;;  %v1428_v46 = vmul.f32 0.2, %v1412_v11 }
 0x147   : > { %v1436_v43 = vsel %vm1420_vm3, %v1412_v11, %v1428_v46 }
 0x148   : > { %v1444_v32 = vpack.c.bf16 %v1436_v43, %v1436_v43  ;;  %v1212_v51 = vpop.f32.mrf.mxu2  ;;  %v1274_v52 = vpop.f32.mrf.mxu3 }
 0x149   : > { %v1097_v13 = vpop.f32.mrf.mxu1  ;;  %v1331_v47 = vpop.f32.mrf.mxu0 }
 0x14a   : > { %v1460_v27 = vunpack.c.l.b16 %v1444_v32  ;;  %v1150_v54 = vrot.slane %v1097_v13, 1  ;;  %v1384_v34 = vrot.slane %v1331_v47, 1 }
 0x14c   : > { %v1468_v56 = vpack.c.b16 %v1460_v27, %v1460_v27  ;;  %v1151_v60 = vsel %vm799_vm2, %v1149_v44, %v1150_v54  ;;  %v1385_v6 = vsel %vm799_vm2, %v1383_v1, %v1384_v34 }
 0x14d   : > { %v1179_v62 = vadd.f32 %v1151_v60, %v2394_v53 }
 0x14e   : > { %v1477_v48 = vshrl.u32 %v1468_v56, 16  ;;  %v1480_v0 = vshll.u32 %v1468_v56, 16 }
 0x14f   : > { %v1241_v63 = vadd.f32 %v1212_v51, %v1179_v62 }
 0x150   : > { %v1479_v25 = vrot.slane %v1477_v48, 7  ;;  %v1214_v55 = vpop.f32.mrf.mxu2  ;;  %v1276_v23 = vpop.f32.mrf.mxu3 }
 0x151   : > { %v1303_v35 = vadd.f32 %v1274_v52, %v1241_v63  ;;  %v1100_v3 = vpop.f32.mrf.mxu1  ;;  %v1334_v53 = vpop.f32.mrf.mxu0 }
 0x152   : > { %v1482_v4 = vor.u32 %v1480_v0, %v1479_v25  ;;  %v1152_v26 = vrot.slane %v1100_v3, 1  ;;  %v1386_v31 = vrot.slane %v1334_v53, 1 }
 0x153   : > { %v1413_v8 = vadd.f32 %v1385_v6, %v1303_v35 }
 0x154   : > { %v1543_v9 = vsel %vm2466_vm8, 0, %v1482_v4 }
 0x155   : > { %v1554_v50 = vsel %vm2470_vm9, %v1543_v9, 0  ;;  %vm1421_vm10 = vcmp.ge.f32.partialorder %v1413_v8, 0.0  ;;  %v1429_v37 = vmul.f32 0.2, %v1413_v8 }
 0x156   : > { %v1570_v10 = vunpack.c.l.b16 %v1554_v50  ;;  %v1571_v14 = vunpack.c.h.b16 %v1554_v50 }
 0x157   : > { %v1437_v15 = vsel %vm1421_vm10, %v1413_v8, %v1429_v37 }
 0x158   : > { %v1586_v16 = vpack.c.b16 %v1570_v10, %v1570_v10  ;;  %v1587_v59 = vpack.c.b16 %v1571_v14, %v1571_v14  ;;  %v1445_v12 = vpack.c.bf16 %v1437_v15, %v1437_v15  ;;  %v1216_v38 = vpop.f32.mrf.mxu2  ;;  %v1278_v17 = vpop.f32.mrf.mxu3 }
 0x159   : > { %v1102_v19 = vpop.f32.mrf.mxu1  ;;  %v1336_v20 = vpop.f32.mrf.mxu0 }
 0x15a   : > { %1618 = vst [vmem:[%s2483_s24] sm:$0xf] %v1586_v16  ;;  %v1461_v22 = vunpack.c.l.b16 %v1445_v12  ;;  %v1153_v40 = vrot.slane %v1102_v19, 1  ;;  %v1387_v33 = vrot.slane %v1336_v20, 1 }
 0x15b   : > { %1619 = vst [vmem:[%s2483_s24 + $0x4] sm:$0xf] %v1587_v59 }
 0x15c   : > { %v1469_v28 = vpack.c.b16 %v1461_v22, %v1461_v22  ;;  %v1154_v29 = vsel %vm799_vm2, %v1152_v26, %v1153_v40  ;;  %v1388_v32 = vsel %vm799_vm2, %v1386_v31, %v1387_v33 }
 0x15d   : > { %v1180_v30 = vadd.f32 %v1154_v29, %v2406_v5 }
 0x15e   : > { %v1484_v24 = vshrl.u32 %v1469_v28, 16  ;;  %v1487_v36 = vshll.u32 %v1469_v28, 16 }
 0x15f   : > { %v1242_v41 = vadd.f32 %v1216_v38, %v1180_v30 }
 0x160   : > { %v1486_v61 = vrot.slane %v1484_v24, 7  ;;  %v1218_v49 = vpop.f32.mrf.mxu2  ;;  %v1280_v42 = vpop.f32.mrf.mxu3 }
 0x161   : > { %v1304_v45 = vadd.f32 %v1278_v17, %v1242_v41  ;;  %v1105_v11 = vpop.f32.mrf.mxu1  ;;  %v1339_v46 = vpop.f32.mrf.mxu0 }
 0x162   : > { %v1489_v43 = vor.u32 %v1487_v36, %v1486_v61  ;;  %v1155_v0 = vrot.slane %v1105_v11, 1  ;;  %v1389_v9 = vrot.slane %v1339_v46, 1 }
 0x163   : > { %v1414_v51 = vadd.f32 %v1388_v32, %v1304_v45 }
 0x164   : > { %v1544_v52 = vsel %vm2466_vm8, 0, %v1489_v43 }
 0x165   : > { %v1555_v5 = vsel %vm2470_vm9, %v1544_v52, 0  ;;  %vm1422_vm11 = vcmp.ge.f32.partialorder %v1414_v51, 0.0  ;;  %v1430_v13 = vmul.f32 0.2, %v1414_v51 }
 0x166   : > { %v1572_v47 = vunpack.c.l.b16 %v1555_v5  ;;  %v1573_v27 = vunpack.c.h.b16 %v1555_v5 }
 0x167   : > { %v1438_v44 = vsel %vm1422_vm11, %v1414_v51, %v1430_v13 }
 0x168   : > { %v1588_v54 = vpack.c.b16 %v1572_v47, %v1572_v47  ;;  %v1589_v56 = vpack.c.b16 %v1573_v27, %v1573_v27  ;;  %v1446_v60 = vpack.c.bf16 %v1438_v44, %v1438_v44  ;;  %v1220_v62 = vpop.f32.mrf.mxu2  ;;  %v1282_v48 = vpop.f32.mrf.mxu3 }
 0x169   : > { %v1107_v34 = vpop.f32.mrf.mxu1  ;;  %v1341_v63 = vpop.f32.mrf.mxu0 }
 0x16a   : > { %1620 = vst [vmem:[%s2483_s24 + $0x8] sm:$0xf] %v1588_v54  ;;  %v1462_v25 = vunpack.c.l.b16 %v1446_v60  ;;  %v1156_v1 = vrot.slane %v1107_v34, 1  ;;  %v1390_v53 = vrot.slane %v1341_v63, 1 }
 0x16b   : > { %1621 = vst [vmem:[%s2483_s24 + $0xc] sm:$0xf] %v1589_v56 }
 0x16c   : > { %v1470_v55 = vpack.c.b16 %v1462_v25, %v1462_v25  ;;  %v1157_v23 = vsel %vm799_vm2, %v1155_v0, %v1156_v1  ;;  %v1391_v59 = vsel %vm799_vm2, %v1389_v9, %v1390_v53 }
 0x16d   : > { %v1181_v35 = vadd.f32 %v1157_v23, %v2417_v18 }
 0x16e   : > { %v1491_v3 = vshrl.u32 %v1470_v55, 16  ;;  %v1494_v8 = vshll.u32 %v1470_v55, 16 }
 0x16f   : > { %v1243_v4 = vadd.f32 %v1220_v62, %v1181_v35 }
 0x170   : > { %v1493_v6 = vrot.slane %v1491_v3, 7  ;;  %v1222_v50 = vpop.f32.mrf.mxu2  ;;  %v1284_v37 = vpop.f32.mrf.mxu3 }
 0x171   : > { %v1305_v10 = vadd.f32 %v1282_v48, %v1243_v4  ;;  %v1110_v14 = vpop.f32.mrf.mxu1  ;;  %v1344_v15 = vpop.f32.mrf.mxu0 }
 0x172   : > { %v1496_v16 = vor.u32 %v1494_v8, %v1493_v6  ;;  %v1158_v61 = vrot.slane %v1110_v14, 1  ;;  %v1392_v51 = vrot.slane %v1344_v15, 1 }
 0x173   : > { %v1415_v12 = vadd.f32 %v1391_v59, %v1305_v10 }
 0x174   : > { %v1545_v38 = vsel %vm2466_vm8, 0, %v1496_v16 }
 0x175   : > { %v1556_v18 = vsel %vm2470_vm9, %v1545_v38, 0  ;;  %vm1423_vm12 = vcmp.ge.f32.partialorder %v1415_v12, 0.0  ;;  %v1431_v17 = vmul.f32 0.2, %v1415_v12 }
 0x176   : > { %v1574_v19 = vunpack.c.l.b16 %v1556_v18  ;;  %v1575_v20 = vunpack.c.h.b16 %v1556_v18 }
 0x177   : > { %v1439_v22 = vsel %vm1423_vm12, %v1415_v12, %v1431_v17 }
 0x178   : > { %v1590_v26 = vpack.c.b16 %v1574_v19, %v1574_v19  ;;  %v1591_v40 = vpack.c.b16 %v1575_v20, %v1575_v20  ;;  %v1447_v28 = vpack.c.bf16 %v1439_v22, %v1439_v22  ;;  %v1224_v29 = vpop.f32.mrf.mxu2  ;;  %v1286_v30 = vpop.f32.mrf.mxu3 }
 0x179   : > { %v1112_v24 = vpop.f32.mrf.mxu1  ;;  %v1346_v33 = vpop.f32.mrf.mxu0 }
 0x17a   : > { %1622 = vst [vmem:[%s2483_s24 + $0x10] sm:$0xf] %v1590_v26  ;;  %v1463_v41 = vunpack.c.l.b16 %v1447_v28  ;;  %v1159_v36 = vrot.slane %v1112_v24, 1  ;;  %v1393_v11 = vrot.slane %v1346_v33, 1 }
 0x17b   : > { %1623 = vst [vmem:[%s2483_s24 + $0x14] sm:$0xf] %v1591_v40 }
 0x17c   : > { %v1471_v31 = vpack.c.b16 %v1463_v41, %v1463_v41  ;;  %v1160_v49 = vsel %vm799_vm2, %v1158_v61, %v1159_v36  ;;  %v1394_v54 = vsel %vm799_vm2, %v1392_v51, %v1393_v11 }
 0x17d   : > { %v1182_v42 = vadd.f32 %v1160_v49, %v2429_v39 }
 0x17e   : > { %v1498_v45 = vshrl.u32 %v1471_v31, 16  ;;  %v1501_v32 = vshll.u32 %v1471_v31, 16 }
 0x17f   : > { %v1244_v46 = vadd.f32 %v1224_v29, %v1182_v42 }
 0x180   : > { %v1500_v43 = vrot.slane %v1498_v45, 7  ;;  %v1226_v52 = vpop.f32.mrf.mxu2  ;;  %v1288_v5 = vpop.f32.mrf.mxu3 }
 0x181   : > { %v1306_v13 = vadd.f32 %v1286_v30, %v1244_v46  ;;  %v1115_v47 = vpop.f32.mrf.mxu1  ;;  %v1349_v27 = vpop.f32.mrf.mxu0 }
 0x182   : > { %v1503_v44 = vor.u32 %v1501_v32, %v1500_v43  ;;  %v1161_v4 = vrot.slane %v1115_v47, 1  ;;  %v1395_v59 = vrot.slane %v1349_v27, 1 }
 0x183   : > { %v1416_v56 = vadd.f32 %v1394_v54, %v1306_v13 }
 0x184   : > { %v1546_v60 = vsel %vm2466_vm8, 0, %v1503_v44 }
 0x185   : > { %v1557_v39 = vsel %vm2470_vm9, %v1546_v60, 0  ;;  %vm1424_vm13 = vcmp.ge.f32.partialorder %v1416_v56, 0.0  ;;  %v1432_v62 = vmul.f32 0.2, %v1416_v56 }
 0x186   : > { %v1576_v48 = vunpack.c.l.b16 %v1557_v39  ;;  %v1577_v34 = vunpack.c.h.b16 %v1557_v39 }
 0x187   : > { %v1440_v63 = vsel %vm1424_vm13, %v1416_v56, %v1432_v62 }
 0x188   : > { %v1592_v25 = vpack.c.b16 %v1576_v48, %v1576_v48  ;;  %v1593_v0 = vpack.c.b16 %v1577_v34, %v1577_v34  ;;  %v1448_v1 = vpack.c.bf16 %v1440_v63, %v1440_v63  ;;  %v1228_v55 = vpop.f32.mrf.mxu2  ;;  %v1290_v23 = vpop.f32.mrf.mxu3 }
 0x189   : > { %v1117_v35 = vpop.f32.mrf.mxu1  ;;  %v1351_v3 = vpop.f32.mrf.mxu0 }
 0x18a   : > { %1624 = vst [vmem:[%s2483_s24 + $0x18] sm:$0xf] %v1592_v25  ;;  %v1464_v53 = vunpack.c.l.b16 %v1448_v1  ;;  %v1162_v6 = vrot.slane %v1117_v35, 1  ;;  %v1396_v10 = vrot.slane %v1351_v3, 1 }
 0x18b   : > { %1625 = vst [vmem:[%s2483_s24 + $0x1c] sm:$0xf] %v1593_v0 }
 0x18c   : > { %v1472_v8 = vpack.c.b16 %v1464_v53, %v1464_v53  ;;  %v1163_v9 = vsel %vm799_vm2, %v1161_v4, %v1162_v6  ;;  %v1397_v22 = vsel %vm799_vm2, %v1395_v59, %v1396_v10 }
 0x18d   : > { %v1183_v50 = vadd.f32 %v1163_v9, %v2441_v57 }
 0x18e   : > { %v1505_v37 = vshrl.u32 %v1472_v8, 16  ;;  %v1508_v16 = vshll.u32 %v1472_v8, 16 }
 0x18f   : > { %v1245_v14 = vadd.f32 %v1228_v55, %v1183_v50 }
 0x190   : > { %v1507_v15 = vrot.slane %v1505_v37, 7  ;;  %v1230_v12 = vpop.f32.mrf.mxu2  ;;  %v1292_v38 = vpop.f32.mrf.mxu3 }
 0x191   : > { %v1307_v18 = vadd.f32 %v1290_v23, %v1245_v14  ;;  %v1120_v17 = vpop.f32.mrf.mxu1  ;;  %v1354_v19 = vpop.f32.mrf.mxu0 }
 0x192   : > { %v1510_v20 = vor.u32 %v1508_v16, %v1507_v15  ;;  %v1164_v11 = vrot.slane %v1120_v17, 1  ;;  %v1398_v44 = vrot.slane %v1354_v19, 1 }
 0x193   : > { %v1417_v26 = vadd.f32 %v1397_v22, %v1307_v18 }
 0x194   : > { %v1547_v40 = vsel %vm2466_vm8, 0, %v1510_v20 }
 0x195   : > { %v1558_v57 = vsel %vm2470_vm9, %v1547_v40, 0  ;;  %vm1425_vm14 = vcmp.ge.f32.partialorder %v1417_v26, 0.0  ;;  %v1433_v28 = vmul.f32 0.2, %v1417_v26 }
 0x196   : > { %v1578_v29 = vunpack.c.l.b16 %v1558_v57  ;;  %v1579_v30 = vunpack.c.h.b16 %v1558_v57 }
 0x197   : > { %v1441_v24 = vsel %vm1425_vm14, %v1417_v26, %v1433_v28 }
 0x198   : > { %v1594_v33 = vpack.c.b16 %v1578_v29, %v1578_v29  ;;  %v1595_v41 = vpack.c.b16 %v1579_v30, %v1579_v30  ;;  %v1449_v61 = vpack.c.bf16 %v1441_v24, %v1441_v24  ;;  %v1232_v36 = vpop.f32.mrf.mxu2  ;;  %v1294_v31 = vpop.f32.mrf.mxu3 }
 0x199   : > { %v1122_v49 = vpop.f32.mrf.mxu1  ;;  %v1356_v42 = vpop.f32.mrf.mxu0 }
 0x19a   : > { %1626 = vst [vmem:[%s2483_s24 + $0x20] sm:$0xf] %v1594_v33  ;;  %v1465_v45 = vunpack.c.l.b16 %v1449_v61  ;;  %v1165_v46 = vrot.slane %v1122_v49, 1  ;;  %v1399_v5 = vrot.slane %v1356_v42, 1 }
 0x19b   : > { %1627 = vst [vmem:[%s2483_s24 + $0x24] sm:$0xf] %v1595_v41 }
 0x19c   : > { %v1473_v43 = vpack.c.b16 %v1465_v45, %v1465_v45  ;;  %v1166_v32 = vsel %vm799_vm2, %v1164_v11, %v1165_v46  ;;  %v1400_v34 = vsel %vm799_vm2, %v1398_v44, %v1399_v5 }
 0x19d   : > { %v1184_v51 = vadd.f32 %v1166_v32, %v2455_v7 }
 0x19e   : > { %v1512_v52 = vshrl.u32 %v1473_v43, 16  ;;  %v1515_v27 = vshll.u32 %v1473_v43, 16 }
 0x19f   : > { %v1246_v13 = vadd.f32 %v1232_v36, %v1184_v51 }
 0x1a0   : > { %v1514_v47 = vrot.slane %v1512_v52, 7  ;;  %v1234_v54 = vpop.f32.mrf.mxu2  ;;  %v1296_v56 = vpop.f32.mrf.mxu3 }
 0x1a1   : > { %v1308_v60 = vadd.f32 %v1294_v31, %v1246_v13  ;;  %v1125_v39 = vpop.f32.mrf.mxu1  ;;  %v1359_v62 = vpop.f32.mrf.mxu0 }
 0x1a2   : > { %v1517_v48 = vor.u32 %v1515_v27, %v1514_v47  ;;  %v1167_v50 = vrot.slane %v1125_v39, 1  ;;  %v1401_v19 = vrot.slane %v1359_v62, 1 }
 0x1a3   : > { %v1418_v63 = vadd.f32 %v1400_v34, %v1308_v60 }
 0x1a4   : > { %v1548_v25 = vsel %vm2466_vm8, 0, %v1517_v48 }
 0x1a5   : > { %v1559_v7 = vsel %vm2470_vm9, %v1548_v25, 0  ;;  %vm1426_vm15 = vcmp.ge.f32.partialorder %v1418_v63, 0.0  ;;  %v1434_v0 = vmul.f32 0.2, %v1418_v63 }
 0x1a6   : > { %v1580_v1 = vunpack.c.l.b16 %v1559_v7  ;;  %v1581_v55 = vunpack.c.h.b16 %v1559_v7 }
 0x1a7   : > { %v1442_v23 = vsel %vm1426_vm15, %v1418_v63, %v1434_v0 }
 0x1a8   : > { %v1596_v35 = vpack.c.b16 %v1580_v1, %v1580_v1  ;;  %v1597_v3 = vpack.c.b16 %v1581_v55, %v1581_v55  ;;  %v1450_v53 = vpack.c.bf16 %v1442_v23, %v1442_v23  ;;  %v1236_v4 = vpop.f32.mrf.mxu2  ;;  %v1298_v6 = vpop.f32.mrf.mxu3 }
 0x1a9   : > { %v1127_v8 = vpop.f32.mrf.mxu1  ;;  %v1361_v10 = vpop.f32.mrf.mxu0 }
 0x1aa   : > { %1628 = vst [vmem:[%s2483_s24 + $0x28] sm:$0xf] %v1596_v35  ;;  %v1466_v9 = vunpack.c.l.b16 %v1450_v53  ;;  %v1168_v37 = vrot.slane %v1127_v8, 1  ;;  %v1402_v12 = vrot.slane %v1361_v10, 1 }
 0x1ab   : > { %1629 = vst [vmem:[%s2483_s24 + $0x2c] sm:$0xf] %v1597_v3 }
 0x1ac   : > { %v1474_v14 = vpack.c.b16 %v1466_v9, %v1466_v9  ;;  %v1169_v15 = vsel %vm799_vm2, %v1167_v50, %v1168_v37  ;;  %v1403_v57 = vsel %vm799_vm2, %v1401_v19, %v1402_v12 }
 0x1ad   : > { %v1185_v16 = vadd.f32 %v1169_v15, %v2459_v21 }
 0x1ae   : > { %v1519_v59 = vshrl.u32 %v1474_v14, 16  ;;  %v1522_v17 = vshll.u32 %v1474_v14, 16 }
 0x1af   : > { %v1247_v38 = vadd.f32 %v1236_v4, %v1185_v16 }
 0x1b0   : > { %v1521_v18 = vrot.slane %v1519_v59, 7  ;;  %v1238_v20 = vpop.f32.mrf.mxu2  ;;  %v1300_v22 = vpop.f32.mrf.mxu3 }
 0x1b1   : > { %v1309_v26 = vadd.f32 %v1298_v6, %v1247_v38 }
 0x1b2   : > { %v1524_v40 = vor.u32 %v1522_v17, %v1521_v18 }
 0x1b3   : > { %v1419_v28 = vadd.f32 %v1403_v57, %v1309_v26 }
 0x1b4   : > { %v1549_v29 = vsel %vm2466_vm8, 0, %v1524_v40 }
 0x1b5   : > { %v1560_v21 = vsel %vm2470_vm9, %v1549_v29, 0  ;;  %vm1427_vm0 = vcmp.ge.f32.partialorder %v1419_v28, 0.0  ;;  %v1435_v30 = vmul.f32 0.2, %v1419_v28 }
 0x1b6   : > { %v1582_v24 = vunpack.c.l.b16 %v1560_v21  ;;  %v1583_v33 = vunpack.c.h.b16 %v1560_v21 }
 0x1b7   : > { %v1443_v41 = vsel %vm1427_vm0, %v1419_v28, %v1435_v30 }
 0x1b8   : > { %v1598_v61 = vpack.c.b16 %v1582_v24, %v1582_v24  ;;  %v1599_v36 = vpack.c.b16 %v1583_v33, %v1583_v33  ;;  %v1451_v31 = vpack.c.bf16 %v1443_v41, %v1443_v41 }
 0x1ba   : > { %1630 = vst [vmem:[%s2483_s24 + $0x30] sm:$0xf] %v1598_v61  ;;  %v1467_v49 = vunpack.c.l.b16 %v1451_v31 }
 0x1bb   : > { %1631 = vst [vmem:[%s2483_s24 + $0x34] sm:$0xf] %v1599_v36 }
 0x1bc   : > { %v1475_v42 = vpack.c.b16 %v1467_v49, %v1467_v49 }
 0x1be   : > { %v1526_v45 = vshrl.u32 %v1475_v42, 16  ;;  %v1529_v46 = vshll.u32 %v1475_v42, 16 }
 0x1c0   : > { %v1528_v11 = vrot.slane %v1526_v45, 7 }
 0x1c2   : > { %v1531_v43 = vor.u32 %v1529_v46, %v1528_v11 }
 0x1c4   : > { %v1550_v32 = vsel %vm2466_vm8, 0, %v1531_v43 }
 0x1c5   : > { %v1561_v51 = vsel %vm2470_vm9, %v1550_v32, 0 }
 0x1c6   : > { %v1584_v52 = vunpack.c.l.b16 %v1561_v51  ;;  %v1585_v5 = vunpack.c.h.b16 %v1561_v51 }
 0x1c8   : > { %v1600_v13 = vpack.c.b16 %v1584_v52, %v1584_v52  ;;  %v1601_v47 = vpack.c.b16 %v1585_v5, %v1585_v5 }
 0x1ca   : > { %1632 = vst [vmem:[%s2483_s24 + $0x38] sm:$0xf] %v1600_v13 }
 0x1cb   : > { %1633 = vst [vmem:[%s2483_s24 + $0x3c] sm:$0xf] %v1601_v47 }
 0x1cc PF: > { %s14_s17 = sadd.s32 1, %s2117_s17   ;;  %s2565_s15 = smov %s2113_s16 }
 0x1cd   : > { %p11_p5 = scmp.ge.s32.totalorder %s14_s17, 4   ;;  %s2566_s16 = smov %s2568_s0 }
 0x1cf   :  { %13 = sbr.rel (!%p11_p5) target bundleno = 2 (0x2), region = 83 }

// kernel: resblock_d_forward.3
= control target key start
LH: loop header
LB: loop body
LE: loop exit
PB: predicated region body
PF: predicated region fallthrough
CT: control target
= control target key end

     0   :  { %s2973_s21 = smov 0   ;;  %s2975_s0 = smov 0   ;;  %s3515_s0 = inlined_call_operand.vmem [shape: bf16[2,8,16,128], index: 0, kind: input, shape index: {}, may-alias: {0,1,2}]   ;;  %s3516_s1 = inlined_call_operand.vmem [shape: bf16[2,8,16,128], index: 1, kind: input, shape index: {}, may-alias: {0,1,2}]   ;;  %s3517_s2 = inlined_call_operand.vmem [shape: bf16[2,8,16,128], index: 2, kind: input, shape index: {}, may-alias: {0,1,2}]   ;;  %s3518_s3 = inlined_call_operand.vmem [shape: bf16[9,128,128], index: 3, kind: input, shape index: {}]   ;;  %s3519_s4 = inlined_call_operand.vmem [shape: bf16[2,8,8,4], index: 4, kind: input, shape index: {}]   ;;  %s3520_s5 = inlined_call_operand.vmem [shape: bf16[4,128], index: 5, kind: input, shape index: {}]   ;;  %s3521_s6 = inlined_call_operand.vmem [shape: bf16[2,8,8,128], index: 6, kind: output, shape index: {}]  }
   0x1   :  { %s2977_s22 = smov 0  }
   0x2 LB: > { %s31_s2 = sadd.s32 1, %s2931_s0  ;;  %p2277_p0 = scmp.ge.s32.totalorder %s2935_s22, 1  ;;  %s2935_s22 = sphi %s2977_s22, %s16_s22   ;;  %s2931_s0 = sphi %s2975_s0, %s3523_s0   ;;  %s2927_s21 = sphi %s2973_s21, %s3522_s21  }
   0x3   : > { %p33_p1 = scmp.ge.s32.totalorder %s31_s2, 2  ;;  %p342_p2 = scmp.lt.s32.totalorder %s2935_s22, 3 }
   0x5   : > { %s3525_s2 = smov (%p33_p1, %s31_s2), 0  ;;  %p343_p3 = pnand %p2277_p0, %p342_p2 }
   0x6   : > { %p445_p4 = scmp.lt.s32.totalorder (!%p343_p3), %s2927_s21, 1 }
   0x7   : > { %346 = sbr.rel (%p343_p3) target bundleno = 488 (0x1e8), region = 44 }
   0xc   : > { %v2779_v0 = vld [vmem:[%s3518_s3 + $0x38] sm:$0xff]  ;;  %v2778_v2 = vld [vmem:[%s3518_s3 + $0x30] sm:$0xff]  ;;  %v2777_v4 = vld [vmem:[%s3518_s3 + $0x28] sm:$0xff]  ;;  %s3527_s21 = smov (!%p445_p4, %s2927_s21), 1  ;;  %v2937_v14 = vmov 0   ;;  %vm1997_vm0 = vcmask 1041408  }
   0xd   : > { %v2787_v1 = vld [vmem:[%s3518_s3 + $0x78] sm:$0xff]  ;;  %644 = vmatpush.bf16.msra.mxu0 %v2779_v0  ;;  %2871 = vmatpush.bf16.msra.mxu2 %v2779_v0  ;;  %v2786_v3 = vld [vmem:[%s3518_s3 + $0x70] sm:$0xff]  ;;  %v2785_v5 = vld [vmem:[%s3518_s3 + $0x68] sm:$0xff]  ;;  %s2759_s29 = sshll.u32 %s3527_s21, 6  ;;  %v564_v15 = vunpack.c.l.b16 %v2937_v14  ;;  %vm823_vm1 = vcmask 1046528   ;;  %vm994_vm2 = vcmask 1045504  }
   0xe   : > { %2872 = vmatpush.bf16.msra.mxu3 %v2779_v0  ;;  %758 = vmatpush.bf16.msra.mxu1 %v2787_v1  ;;  %v2776_v6 = vld [vmem:[%s3518_s3 + $0x20] sm:$0xff]  ;;  %v2775_v8 = vld [vmem:[%s3518_s3 + $0x18] sm:$0xff]  ;;  %v2774_v10 = vld [vmem:[%s3518_s3 + $0x10] sm:$0xff]  ;;  %s3046_s10 = scalar_lea.vmem %s3516_s1, %s2759_s29  ;;  %vm1984_vm3 = vcmask 31744  }
   0xf   : > { %v2784_v7 = vld [vmem:[%s3518_s3 + $0x60] sm:$0xff]  ;;  %v2783_v9 = vld [vmem:[%s3518_s3 + $0x58] sm:$0xff]  ;;  %v2782_v11 = vld [vmem:[%s3518_s3 + $0x50] sm:$0xff]  ;;  %v3057_v20 = vpack.c.b16 %v564_v15, %v564_v15 }
  0x10   : > { %v2773_v12 = vld [vmem:[%s3518_s3 + $0x8] sm:$0xff]  ;;  %v2772_v16 = vld [vmem:[%s3518_s3] sm:$0xff]  ;;  %v2803_v18 = vld [vmem:[%s3518_s3 + $0xf8] sm:$0xff] }
  0x11   : > { %645 = vmatpush.bf16.msra.mxu0 %v2778_v2  ;;  %2873 = vmatpush.bf16.msra.mxu2 %v2778_v2  ;;  %v2781_v13 = vld [vmem:[%s3518_s3 + $0x48] sm:$0xff]  ;;  %v2780_v17 = vld [vmem:[%s3518_s3 + $0x40] sm:$0xff]  ;;  %v2795_v19 = vld [vmem:[%s3518_s3 + $0xb8] sm:$0xff] }
  0x12   : > { %2874 = vmatpush.bf16.msra.mxu3 %v2778_v2  ;;  %759 = vmatpush.bf16.msra.mxu1 %v2786_v3  ;;  %v3060_v21 = vld [vmem:[%s3046_s10 + $0x10] sm:$0xff]  ;;  %v3063_v22 = vld [vmem:[%s3046_s10 + $0x20] sm:$0xff]  ;;  %v2811_v23 = vld [vmem:[%s3518_s3 + $0x138] sm:$0xff] }
  0x13   : > { %v2819_v24 = vld [vmem:[%s3518_s3 + $0x178] sm:$0xff]  ;;  %v2794_v25 = vld [vmem:[%s3518_s3 + $0xb0] sm:$0xff]  ;;  %v2793_v29 = vld [vmem:[%s3518_s3 + $0xa8] sm:$0xff] }
  0x14   : > { %v2802_v26 = vld [vmem:[%s3518_s3 + $0xf0] sm:$0xff]  ;;  %v2801_v30 = vld [vmem:[%s3518_s3 + $0xe8] sm:$0xff]  ;;  %v2792_v33 = vld [vmem:[%s3518_s3 + $0xa0] sm:$0xff] }
  0x15   : > { %646 = vmatpush.bf16.msra.mxu0 %v2777_v4  ;;  %2875 = vmatpush.bf16.msra.mxu2 %v2777_v4  ;;  %v2810_v27 = vld [vmem:[%s3518_s3 + $0x130] sm:$0xff]  ;;  %v2809_v31 = vld [vmem:[%s3518_s3 + $0x128] sm:$0xff]  ;;  %v2800_v34 = vld [vmem:[%s3518_s3 + $0xe0] sm:$0xff] }
  0x16   : > { %2876 = vmatpush.bf16.msra.mxu3 %v2777_v4  ;;  %760 = vmatpush.bf16.msra.mxu1 %v2785_v5  ;;  %v2818_v28 = vld [vmem:[%s3518_s3 + $0x170] sm:$0xff]  ;;  %v2817_v32 = vld [vmem:[%s3518_s3 + $0x168] sm:$0xff]  ;;  %v2808_v35 = vld [vmem:[%s3518_s3 + $0x120] sm:$0xff] }
  0x17   : > { %v2791_v36 = vld [vmem:[%s3518_s3 + $0x98] sm:$0xff]  ;;  %v3115_v38 = vld [vmem:[%s3046_s10] sm:$0xff]  ;;  %v3121_v40 = vld [vmem:[%s3046_s10 + $0x28] sm:$0xff] }
  0x18   : > { %v2799_v37 = vld [vmem:[%s3518_s3 + $0xd8] sm:$0xff]  ;;  %v2790_v42 = vld [vmem:[%s3518_s3 + $0x90] sm:$0xff]  ;;  %v2816_v45 = vld [vmem:[%s3518_s3 + $0x160] sm:$0xff] }
  0x19   : > { %647 = vmatpush.bf16.msra.mxu0 %v2776_v6  ;;  %2877 = vmatpush.bf16.msra.mxu2 %v2776_v6  ;;  %v3118_v39 = vld [vmem:[%s3046_s10 + $0x18] sm:$0xff]  ;;  %v2798_v43 = vld [vmem:[%s3518_s3 + $0xd0] sm:$0xff]  ;;  %v2789_v46 = vld [vmem:[%s3518_s3 + $0x88] sm:$0xff] }
  0x1a   : > { %2878 = vmatpush.bf16.msra.mxu3 %v2776_v6  ;;  %761 = vmatpush.bf16.msra.mxu1 %v2784_v7  ;;  %v2807_v41 = vld [vmem:[%s3518_s3 + $0x118] sm:$0xff]  ;;  %v2806_v44 = vld [vmem:[%s3518_s3 + $0x110] sm:$0xff]  ;;  %v2797_v47 = vld [vmem:[%s3518_s3 + $0xc8] sm:$0xff] }
  0x1b   : > { %v2805_v48 = vld [vmem:[%s3518_s3 + $0x108] sm:$0xff]  ;;  %v2788_v49 = vld [vmem:[%s3518_s3 + $0x80] sm:$0xff]  ;;  %v2827_v51 = vld [vmem:[%s3518_s3 + $0x1b8] sm:$0xff] }
  0x1c   : > { %v2796_v50 = vld [vmem:[%s3518_s3 + $0xc0] sm:$0xff]  ;;  %v2835_v52 = vld [vmem:[%s3518_s3 + $0x1f8] sm:$0xff]  ;;  %v3170_v55 = vld [vmem:[%s3046_s10 + $0x8] sm:$0xff] }
  0x1d   : > { %648 = vmatpush.bf16.msra.mxu0 %v2775_v8  ;;  %2879 = vmatpush.bf16.msra.mxu2 %v2775_v8  ;;  %v2804_v53 = vld [vmem:[%s3518_s3 + $0x100] sm:$0xff]  ;;  %v2843_v54 = vld [vmem:[%s3518_s3 + $0x238] sm:$0xff]  ;;  %v3173_v56 = vld [vmem:[%s3046_s10 + $0x30] sm:$0xff] }
  0x1e   : > { %2880 = vmatpush.bf16.msra.mxu3 %v2775_v8  ;;  %762 = vmatpush.bf16.msra.mxu1 %v2783_v9  ;;  %v2826_v57 = vld [vmem:[%s3518_s3 + $0x1b0] sm:$0xff]  ;;  %v2825_v60 = vld [vmem:[%s3518_s3 + $0x1a8] sm:$0xff]  ;;  %v2815_v61 = vld [vmem:[%s3518_s3 + $0x158] sm:$0xff] }
  0x1f   : > { %v2834_v58 = vld [vmem:[%s3518_s3 + $0x1f0] sm:$0xff]  ;;  %v2833_v62 = vld [vmem:[%s3518_s3 + $0x1e8] sm:$0xff]  ;;  %v2824_v63 = vld [vmem:[%s3518_s3 + $0x1a0] sm:$0xff] }
  0x20   : > { %v2842_v59 = vld [vmem:[%s3518_s3 + $0x230] sm:$0xff]  ;;  %v2841_v0 = vld [vmem:[%s3518_s3 + $0x228] sm:$0xff]  ;;  %v2832_v2 = vld [vmem:[%s3518_s3 + $0x1e0] sm:$0xff] }
  0x21   : > { %649 = vmatpush.bf16.msra.mxu0 %v2774_v10  ;;  %2881 = vmatpush.bf16.msra.mxu2 %v2774_v10  ;;  %v2814_v1 = vld [vmem:[%s3518_s3 + $0x150] sm:$0xff]  ;;  %v2823_v3 = vld [vmem:[%s3518_s3 + $0x198] sm:$0xff]  ;;  %v2840_v4 = vld [vmem:[%s3518_s3 + $0x220] sm:$0xff] }
  0x22   : > { %2882 = vmatpush.bf16.msra.mxu3 %v2774_v10  ;;  %763 = vmatpush.bf16.msra.mxu1 %v2782_v11  ;;  %v2813_v5 = vld [vmem:[%s3518_s3 + $0x148] sm:$0xff]  ;;  %v2831_v6 = vld [vmem:[%s3518_s3 + $0x1d8] sm:$0xff]  ;;  %v2822_v7 = vld [vmem:[%s3518_s3 + $0x190] sm:$0xff] }
  0x23   : > { %v2839_v8 = vld [vmem:[%s3518_s3 + $0x218] sm:$0xff]  ;;  %v2812_v9 = vld [vmem:[%s3518_s3 + $0x140] sm:$0xff]  ;;  %v2830_v10 = vld [vmem:[%s3518_s3 + $0x1d0] sm:$0xff] }
  0x24   : > { %v2821_v11 = vld [vmem:[%s3518_s3 + $0x188] sm:$0xff] }
  0x25   : > { %650 = vmatpush.bf16.msra.mxu0 %v2773_v12  ;;  %2883 = vmatpush.bf16.msra.mxu2 %v2773_v12  ;;  %v2829_v15 = vld [vmem:[%s3518_s3 + $0x1c8] sm:$0xff] }
  0x26   : > { %2884 = vmatpush.bf16.msra.mxu3 %v2773_v12  ;;  %764 = vmatpush.bf16.msra.mxu1 %v2781_v13  ;;  %v2838_v12 = vld [vmem:[%s3518_s3 + $0x210] sm:$0xff]  ;;  %v1963_v13 = vld [vmem:[%s3520_s5] sm:$0x3] }
  0x27   : > { %v1999_v14 = vsel %vm1997_vm0, %v1963_v13, 0 }
  0x29   : > { %651 = vmatpush.bf16.msra.mxu0 %v2772_v16  ;;  %2885 = vmatpush.bf16.msra.mxu2 %v2772_v16 }
  0x2a   : > { %2886 = vmatpush.bf16.msra.mxu3 %v2772_v16  ;;  %765 = vmatpush.bf16.msra.mxu1 %v2780_v17  ;;  %v2820_v16 = vld [vmem:[%s3518_s3 + $0x180] sm:$0xff]  ;;  %v2837_v17 = vld [vmem:[%s3518_s3 + $0x208] sm:$0xff] }
  0x2c   : > { %652 = vmatmul.bf16.vlgmr.msra.gmra.mxu0 %v3057_v20  ;;  %664 = vmatmul.bf16.vlgmr.msra.gmra.mxu2 %v3060_v21 }
  0x2d   : > { %929 = vmatpush.bf16.msrb.mxu2 %v2795_v19  ;;  %672 = vmatmul.bf16.vlgmr.msra.gmra.mxu3 %v3063_v22 }
  0x2e   : > { %1106 = vmatpush.bf16.msrb.mxu3 %v2803_v18  ;;  %766 = vmatmul.bf16.vlgmr.msra.gmra.mxu1 %v3057_v20 }
  0x2f   : > { %1220 = vmatpush.bf16.msrb.mxu0 %v2811_v23  ;;  %1390 = vmatpush.bf16.msrb.mxu1 %v2819_v24  ;;  %v2828_v23 = vld [vmem:[%s3518_s3 + $0x1c0] sm:$0xff] }
  0x31   : > { %930 = vmatpush.bf16.msrb.mxu2 %v2794_v25 }
  0x32   : > { %1107 = vmatpush.bf16.msrb.mxu3 %v2802_v26 }
  0x33   : > { %1221 = vmatpush.bf16.msrb.mxu0 %v2810_v27  ;;  %1391 = vmatpush.bf16.msrb.mxu1 %v2818_v28 }
  0x35   : > { %931 = vmatpush.bf16.msrb.mxu2 %v2793_v29 }
  0x36   : > { %1108 = vmatpush.bf16.msrb.mxu3 %v2801_v30  ;;  %v2836_v30 = vld [vmem:[%s3518_s3 + $0x200] sm:$0xff] }
  0x37   : > { %1222 = vmatpush.bf16.msrb.mxu0 %v2809_v31  ;;  %1392 = vmatpush.bf16.msrb.mxu1 %v2817_v32 }
  0x39   : > { %932 = vmatpush.bf16.msrb.mxu2 %v2792_v33 }
  0x3a   : > { %1109 = vmatpush.bf16.msrb.mxu3 %v2800_v34 }
  0x3b   : > { %1223 = vmatpush.bf16.msrb.mxu0 %v2808_v35  ;;  %1393 = vmatpush.bf16.msrb.mxu1 %v2816_v45 }
  0x3c   : > { %656 = vmatmul.bf16.gmra.mxu0 %v3115_v38  ;;  %668 = vmatmul.bf16.gmra.mxu2 %v3118_v39 }
  0x3d   : > { %933 = vmatpush.bf16.msrb.mxu2 %v2791_v36  ;;  %676 = vmatmul.bf16.gmra.mxu3 %v3121_v40 }
  0x3e   : > { %1110 = vmatpush.bf16.msrb.mxu3 %v2799_v37  ;;  %771 = vmatmul.bf16.gmra.mxu1 %v3115_v38 }
  0x3f   : > { %1224 = vmatpush.bf16.msrb.mxu0 %v2807_v41  ;;  %1394 = vmatpush.bf16.msrb.mxu1 %v2815_v61 }
  0x41   : > { %934 = vmatpush.bf16.msrb.mxu2 %v2790_v42 }
  0x42   : > { %1111 = vmatpush.bf16.msrb.mxu3 %v2798_v43 }
  0x43   : > { %1225 = vmatpush.bf16.msrb.mxu0 %v2806_v44  ;;  %1395 = vmatpush.bf16.msrb.mxu1 %v2814_v1 }
  0x45   : > { %935 = vmatpush.bf16.msrb.mxu2 %v2789_v46 }
  0x46   : > { %1112 = vmatpush.bf16.msrb.mxu3 %v2797_v47 }
  0x47   : > { %1226 = vmatpush.bf16.msrb.mxu0 %v2805_v48  ;;  %1396 = vmatpush.bf16.msrb.mxu1 %v2813_v5 }
  0x49   : > { %936 = vmatpush.bf16.msrb.mxu2 %v2788_v49  ;;  %v3296_v49 = vld [vmem:[%s3046_s10 + $0x38] sm:$0xff]  ;;  %s2762_s10 = sshll.u32 %s3527_s21, 5 }
  0x4a   : > { %1113 = vmatpush.bf16.msrb.mxu3 %v2796_v50  ;;  %s3360_s26 = scalar_lea.vmem %s3519_s4, %s2762_s10  ;;  %s3461_s29 = scalar_lea.vmem %s3521_s6, %s2762_s10 }
  0x4b   : > { %1227 = vmatpush.bf16.msrb.mxu0 %v2804_v53  ;;  %1397 = vmatpush.bf16.msrb.mxu1 %v2812_v9 }
  0x4c   : > { %660 = vmatmul.bf16.gmra.mxu0 %v3170_v55  ;;  %937 = vmatmul.bf16.vlgmr.msrb.gmra.mxu2 %v3057_v20 }
  0x4d   : > { %1566 = vmatpush.bf16.msra.mxu2 %v2827_v51  ;;  %680 = vmatmul.bf16.gmra.mxu3 %v3173_v56 }
  0x4e   : > { %1680 = vmatpush.bf16.msra.mxu3 %v2835_v52  ;;  %776 = vmatmul.bf16.gmra.mxu1 %v3170_v55 }
  0x4f   : > { %1850 = vmatpush.bf16.msra.mxu0 %v2843_v54  ;;  %2008 = vmatpush.bf16.msra.mxu1 %v1999_v14 }
  0x51   : > { %1567 = vmatpush.bf16.msra.mxu2 %v2826_v57 }
  0x52   : > { %1681 = vmatpush.bf16.msra.mxu3 %v2834_v58 }
  0x53   : > { %1851 = vmatpush.bf16.msra.mxu0 %v2842_v59 }
  0x55   : > { %1568 = vmatpush.bf16.msra.mxu2 %v2825_v60 }
  0x56   : > { %1682 = vmatpush.bf16.msra.mxu3 %v2833_v62 }
  0x57   : > { %1852 = vmatpush.bf16.msra.mxu0 %v2841_v0 }
  0x59   : > { %1569 = vmatpush.bf16.msra.mxu2 %v2824_v63 }
  0x5a   : > { %1683 = vmatpush.bf16.msra.mxu3 %v2832_v2 }
  0x5b   : > { %1853 = vmatpush.bf16.msra.mxu0 %v2840_v4 }
  0x5c   : > { %942 = vmatmul.bf16.gmra.mxu2 %v3115_v38  ;;  %1228 = vmatmul.bf16.vlgmr.msrb.gmra.mxu0 %v3115_v38 }
  0x5d   : > { %1114 = vmatmul.bf16.vlgmr.msrb.gmra.mxu3 %v3115_v38  ;;  %1570 = vmatpush.bf16.msra.mxu2 %v2823_v3 }
  0x5e   : > { %781 = vmatmul.bf16.gmra.mxu1 %v3060_v21  ;;  %1684 = vmatpush.bf16.msra.mxu3 %v2831_v6 }
  0x5f   : > { %1854 = vmatpush.bf16.msra.mxu0 %v2839_v8 }
  0x61   : > { %1571 = vmatpush.bf16.msra.mxu2 %v2822_v7 }
  0x62   : > { %1685 = vmatpush.bf16.msra.mxu3 %v2830_v10 }
  0x63   : > { %1855 = vmatpush.bf16.msra.mxu0 %v2838_v12 }
  0x65   : > { %1572 = vmatpush.bf16.msra.mxu2 %v2821_v11 }
  0x66   : > { %1686 = vmatpush.bf16.msra.mxu3 %v2829_v15 }
  0x67   : > { %1856 = vmatpush.bf16.msra.mxu0 %v2837_v17 }
  0x69   : > { %1573 = vmatpush.bf16.msra.mxu2 %v2820_v16 }
  0x6a   : > { %1687 = vmatpush.bf16.msra.mxu3 %v2828_v23 }
  0x6b   : > { %1857 = vmatpush.bf16.msra.mxu0 %v2836_v30 }
  0x6c   : > { %947 = vmatmul.bf16.gmra.mxu2 %v3170_v55  ;;  %1233 = vmatmul.bf16.gmra.mxu0 %v3170_v55 }
  0x6d   : > { %1118 = vmatmul.bf16.gmra.mxu3 %v3170_v55  ;;  %2887 = vmatpush.bf16.msrb.mxu2 %v1999_v14 }
  0x6e   : > { %786 = vmatmul.bf16.gmra.mxu1 %v3118_v39 }
  0x7c   : > { %952 = vmatmul.bf16.gmra.mxu2 %v3060_v21  ;;  %1238 = vmatmul.bf16.gmra.mxu0 %v3060_v21 }
  0x7d   : > { %1122 = vmatmul.bf16.gmra.mxu3 %v3060_v21 }
  0x7e   : > { %791 = vmatmul.bf16.gmra.mxu1 %v3063_v22 }
  0x8c   : > { %957 = vmatmul.bf16.gmra.mxu2 %v3118_v39  ;;  %1243 = vmatmul.bf16.gmra.mxu0 %v3118_v39 }
  0x8d   : > { %1126 = vmatmul.bf16.gmra.mxu3 %v3118_v39 }
  0x8e   : > { %796 = vmatmul.bf16.gmra.mxu1 %v3121_v40 }
  0x9c   : > { %962 = vmatmul.bf16.gmra.mxu2 %v3063_v22  ;;  %1248 = vmatmul.bf16.gmra.mxu0 %v3063_v22 }
  0x9d   : > { %1130 = vmatmul.bf16.gmra.mxu3 %v3063_v22 }
  0x9e   : > { %801 = vmatmul.bf16.gmra.mxu1 %v3173_v56 }
  0xa9   : > { %v653_v18 = vpop.f32.mrf.mxu0 }
  0xab   : > { %v767_v19 = vpop.f32.mrf.mxu1 }
  0xac   : > { %967 = vmatmul.bf16.gmra.mxu2 %v3121_v40  ;;  %1253 = vmatmul.bf16.gmra.mxu0 %v3121_v40  ;;  %v824_v26 = vrot.slane %v767_v19, 1 }
  0xad   : > { %1134 = vmatmul.bf16.gmra.mxu3 %v3121_v40 }
  0xae   : > { %1398 = vmatmul.bf16.vlgmr.msrb.gmra.mxu1 %v3115_v38 }
  0xaf   : > { %v3278_v24 = vpop.f32.mrf.mxu2 }
  0xb0   : > { %v3280_v25 = vpop.f32.mrf.mxu3 }
  0xb1   : > { %v655_v27 = vpop.f32.mrf.mxu0 }
  0xb3   : > { %v769_v28 = vpop.f32.mrf.mxu1 }
  0xb4   : > { %v825_v29 = vrot.slane %v769_v28, 1 }
  0xb6   : > { %v826_v31 = vsel %vm823_vm1, %v824_v26, %v825_v29 }
  0xb7   : > { %v856_v32 = vadd.f32 %v826_v31, %v653_v18  ;;  %v667_v33 = vpop.f32.mrf.mxu2 }
  0xb8   : > { %v675_v34 = vpop.f32.mrf.mxu3 }
  0xb9   : > { %v657_v35 = vpop.f32.mrf.mxu0 }
  0xbb   : > { %v772_v36 = vpop.f32.mrf.mxu1 }
  0xbc   : > { %972 = vmatmul.bf16.gmra.mxu2 %v3173_v56  ;;  %1258 = vmatmul.bf16.gmra.mxu0 %v3173_v56  ;;  %v827_v41 = vrot.slane %v772_v36, 1 }
  0xbd   : > { %1138 = vmatmul.bf16.gmra.mxu3 %v3173_v56 }
  0xbe   : > { %1403 = vmatmul.bf16.gmra.mxu1 %v3170_v55 }
  0xbf   : > { %v3290_v37 = vpop.f32.mrf.mxu2 }
  0xc0   : > { %v3292_v38 = vpop.f32.mrf.mxu3 }
  0xc1   : > { %v659_v42 = vpop.f32.mrf.mxu0 }
  0xc3   : > { %v774_v43 = vpop.f32.mrf.mxu1 }
  0xc4   : > { %v828_v44 = vrot.slane %v774_v43, 1 }
  0xc6   : > { %v829_v45 = vsel %vm823_vm1, %v827_v41, %v828_v44 }
  0xc7   : > { %v857_v46 = vadd.f32 %v829_v45, %v657_v35  ;;  %v671_v47 = vpop.f32.mrf.mxu2 }
  0xc8   : > { %v679_v48 = vpop.f32.mrf.mxu3 }
  0xc9   : > { %v661_v50 = vpop.f32.mrf.mxu0 }
  0xcb   : > { %v777_v51 = vpop.f32.mrf.mxu1 }
  0xcc   : > { %1263 = vmatmul.bf16.gmra.mxu0 %v3296_v49  ;;  %1574 = vmatmul.bf16.vlgmr.msra.gmra.mxu2 %v3170_v55  ;;  %v830_v54 = vrot.slane %v777_v51, 1 }
  0xcd   : > { %1142 = vmatmul.bf16.gmra.mxu3 %v3296_v49 }
  0xce   : > { %1408 = vmatmul.bf16.gmra.mxu1 %v3060_v21 }
  0xcf   : > { %v938_v52 = vpop.f32.mrf.mxu2 }
  0xd0   : > { %v3302_v53 = vpop.f32.mrf.mxu3  ;;  %v995_v61 = vrot.slane %v938_v52, 2 }
  0xd1   : > { %v663_v57 = vpop.f32.mrf.mxu0 }
  0xd3   : > { %v779_v58 = vpop.f32.mrf.mxu1 }
  0xd4   : > { %v831_v59 = vrot.slane %v779_v58, 1 }
  0xd6   : > { %v832_v60 = vsel %vm823_vm1, %v830_v54, %v831_v59 }
  0xd7   : > { %v858_v62 = vadd.f32 %v832_v60, %v661_v50  ;;  %v940_v63 = vpop.f32.mrf.mxu2 }
  0xd8   : > { %v683_v0 = vpop.f32.mrf.mxu3  ;;  %v996_v1 = vrot.slane %v940_v63, 2 }
  0xd9   : > { %v1229_v2 = vpop.f32.mrf.mxu0 }
  0xda   : > { %v997_v4 = vsel %vm994_vm2, %v995_v61, %v996_v1  ;;  %v1285_v7 = vrot.slane %v1229_v2, 1 }
  0xdb   : > { %v782_v3 = vpop.f32.mrf.mxu1  ;;  %v1027_v5 = vadd.f32 %v997_v4, %v856_v32 }
  0xdc   : > { %1578 = vmatmul.bf16.gmra.mxu2 %v3060_v21  ;;  %1858 = vmatmul.bf16.vlgmr.msra.gmra.mxu0 %v3170_v55  ;;  %v833_v9 = vrot.slane %v782_v3, 1 }
  0xdd   : > { %1688 = vmatmul.bf16.vlgmr.msra.gmra.mxu3 %v3170_v55 }
  0xde   : > { %1413 = vmatmul.bf16.gmra.mxu1 %v3118_v39 }
  0xdf   : > { %v943_v6 = vpop.f32.mrf.mxu2 }
  0xe0   : > { %v1115_v8 = vpop.f32.mrf.mxu3  ;;  %v998_v18 = vrot.slane %v943_v6, 2 }
  0xe1   : > { %v1147_v10 = vadd.f32 %v1115_v8, %v1027_v5  ;;  %v1231_v11 = vpop.f32.mrf.mxu0 }
  0xe2   : > { %v1286_v13 = vrot.slane %v1231_v11, 1 }
  0xe3   : > { %v784_v12 = vpop.f32.mrf.mxu1 }
  0xe4   : > { %v834_v14 = vrot.slane %v784_v12, 1  ;;  %v1287_v15 = vsel %vm823_vm1, %v1285_v7, %v1286_v13 }
  0xe5   : > { %v3312_v17 = vadd.f32 %v1287_v15, %v1147_v10 }
  0xe6   : > { %v835_v16 = vsel %vm823_vm1, %v833_v9, %v834_v14 }
  0xe7   : > { %v859_v19 = vadd.f32 %v835_v16, %v3278_v24  ;;  %v945_v23 = vpop.f32.mrf.mxu2 }
  0xe8   : > { %v999_v55 = vrot.slane %v945_v23, 2  ;;  %v1117_v26 = vpop.f32.mrf.mxu3 }
  0xe9   : > { %v1234_v27 = vpop.f32.mrf.mxu0 }
  0xea   : > { %v1000_v29 = vsel %vm994_vm2, %v998_v18, %v999_v55  ;;  %v1288_v32 = vrot.slane %v1234_v27, 1 }
  0xeb   : > { %v787_v28 = vpop.f32.mrf.mxu1  ;;  %v1028_v30 = vadd.f32 %v1000_v29, %v857_v46 }
  0xec   : > { %1582 = vmatmul.bf16.gmra.mxu2 %v3118_v39  ;;  %1863 = vmatmul.bf16.gmra.mxu0 %v3060_v21  ;;  %v836_v24 = vrot.slane %v787_v28, 1 }
  0xed   : > { %1693 = vmatmul.bf16.gmra.mxu3 %v3060_v21 }
  0xee   : > { %1418 = vmatmul.bf16.gmra.mxu1 %v3063_v22 }
  0xef   : > { %v948_v31 = vpop.f32.mrf.mxu2 }
  0xf0   : > { %v1119_v33 = vpop.f32.mrf.mxu3  ;;  %v1001_v46 = vrot.slane %v948_v31, 2 }
  0xf1   : > { %v1148_v34 = vadd.f32 %v1119_v33, %v1028_v30  ;;  %v1236_v35 = vpop.f32.mrf.mxu0 }
  0xf2   : > { %v1289_v41 = vrot.slane %v1236_v35, 1 }
  0xf3   : > { %v789_v36 = vpop.f32.mrf.mxu1 }
  0xf4   : > { %v837_v42 = vrot.slane %v789_v36, 1  ;;  %v1290_v43 = vsel %vm823_vm1, %v1288_v32, %v1289_v41 }
  0xf5   : > { %v3322_v45 = vadd.f32 %v1290_v43, %v1148_v34 }
  0xf6   : > { %v838_v44 = vsel %vm823_vm1, %v836_v24, %v837_v42 }
  0xf7   : > { %v860_v47 = vadd.f32 %v838_v44, %v3290_v37  ;;  %v950_v48 = vpop.f32.mrf.mxu2 }
  0xf8   : > { %v1002_v21 = vrot.slane %v950_v48, 2  ;;  %v1121_v50 = vpop.f32.mrf.mxu3 }
  0xf9   : > { %v1239_v51 = vpop.f32.mrf.mxu0 }
  0xfa   : > { %v1003_v54 = vsel %vm994_vm2, %v1001_v46, %v1002_v21  ;;  %v1291_v59 = vrot.slane %v1239_v51, 1 }
  0xfb   : > { %v792_v52 = vpop.f32.mrf.mxu1  ;;  %v1029_v57 = vadd.f32 %v1003_v54, %v858_v62 }
  0xfc   : > { %1586 = vmatmul.bf16.gmra.mxu2 %v3063_v22  ;;  %1868 = vmatmul.bf16.gmra.mxu0 %v3118_v39  ;;  %v839_v37 = vrot.slane %v792_v52, 1 }
  0xfd   : > { %1698 = vmatmul.bf16.gmra.mxu3 %v3118_v39 }
  0xfe   : > { %1423 = vmatmul.bf16.gmra.mxu1 %v3121_v40 }
  0xff   : > { %v953_v58 = vpop.f32.mrf.mxu2 }
 0x100   : > { %v1123_v60 = vpop.f32.mrf.mxu3  ;;  %v1004_v5 = vrot.slane %v953_v58, 2 }
 0x101   : > { %v1149_v61 = vadd.f32 %v1123_v60, %v1029_v57  ;;  %v1241_v63 = vpop.f32.mrf.mxu0 }
 0x102   : > { %v1292_v1 = vrot.slane %v1241_v63, 1 }
 0x103   : > { %v794_v0 = vpop.f32.mrf.mxu1 }
 0x104   : > { %v840_v2 = vrot.slane %v794_v0, 1  ;;  %v1293_v3 = vsel %vm823_vm1, %v1291_v59, %v1292_v1  ;;  %v2844_v59 = vld [vmem:[%s3360_s26] sm:$0xff] }
 0x105   : > { %v3332_v4 = vadd.f32 %v1293_v3, %v1149_v61 }
 0x106   : > { %v841_v62 = vsel %vm823_vm1, %v839_v37, %v840_v2 }
 0x107   : > { %v955_v6 = vpop.f32.mrf.mxu2  ;;  %v861_v60 = vadd.f32 %v841_v62, %v3280_v25 }
 0x108   : > { %v1005_v7 = vrot.slane %v955_v6, 2  ;;  %v1125_v8 = vpop.f32.mrf.mxu3 }
 0x109   : > { %v1244_v39 = vpop.f32.mrf.mxu0 }
 0x10a   : > { %v1006_v10 = vsel %vm994_vm2, %v1004_v5, %v1005_v7  ;;  %v1294_v13 = vrot.slane %v1244_v39, 1 }
 0x10b   : > { %v797_v9 = vpop.f32.mrf.mxu1  ;;  %v1030_v11 = vadd.f32 %v1006_v10, %v859_v19 }
 0x10c   : > { %1590 = vmatmul.bf16.gmra.mxu2 %v3121_v40  ;;  %1873 = vmatmul.bf16.gmra.mxu0 %v3063_v22  ;;  %v842_v15 = vrot.slane %v797_v9, 1 }
 0x10d   : > { %1703 = vmatmul.bf16.gmra.mxu3 %v3063_v22 }
 0x10e   : > { %1428 = vmatmul.bf16.gmra.mxu1 %v3173_v56 }
 0x10f   : > { %v958_v12 = vpop.f32.mrf.mxu2 }
 0x110   : > { %v1127_v14 = vpop.f32.mrf.mxu3  ;;  %v1007_v29 = vrot.slane %v958_v12, 2 }
 0x111   : > { %v1150_v16 = vadd.f32 %v1127_v14, %v1030_v11  ;;  %v1246_v18 = vpop.f32.mrf.mxu0 }
 0x112   : > { %v1295_v55 = vrot.slane %v1246_v18, 1 }
 0x113   : > { %v799_v23 = vpop.f32.mrf.mxu1 }
 0x114   : > { %v843_v26 = vrot.slane %v799_v23, 1  ;;  %v1296_v27 = vsel %vm823_vm1, %v1294_v13, %v1295_v55 }
 0x115   : > { %v3341_v28 = vadd.f32 %v1296_v27, %v1150_v16 }
 0x116   : > { %v844_v19 = vsel %vm823_vm1, %v842_v15, %v843_v26  ;;  %v2845_v15 = vld [vmem:[%s3360_s26 + $0x8] sm:$0xff] }
 0x117   : > { %v960_v30 = vpop.f32.mrf.mxu2  ;;  %v862_v16 = vadd.f32 %v844_v19, %v3292_v38 }
 0x118   : > { %v1008_v31 = vrot.slane %v960_v30, 2  ;;  %v1129_v32 = vpop.f32.mrf.mxu3 }
 0x119   : > { %v1249_v22 = vpop.f32.mrf.mxu0 }
 0x11a   : > { %v1009_v24 = vsel %vm994_vm2, %v1007_v29, %v1008_v31  ;;  %v1297_v36 = vrot.slane %v1249_v22, 1 }
 0x11b   : > { %v802_v33 = vpop.f32.mrf.mxu1  ;;  %v1031_v34 = vadd.f32 %v1009_v24, %v860_v47 }
 0x11c   : > { %1594 = vmatmul.bf16.gmra.mxu2 %v3173_v56  ;;  %1878 = vmatmul.bf16.gmra.mxu0 %v3121_v40  ;;  %v845_v42 = vrot.slane %v802_v33, 1 }
 0x11d   : > { %1708 = vmatmul.bf16.gmra.mxu3 %v3121_v40 }
 0x11e   : > { %1433 = vmatmul.bf16.gmra.mxu1 %v3296_v49 }
 0x11f   : > { %v963_v35 = vpop.f32.mrf.mxu2 }
 0x120   : > { %v1131_v41 = vpop.f32.mrf.mxu3  ;;  %v1010_v52 = vrot.slane %v963_v35, 2 }
 0x121   : > { %v1151_v43 = vadd.f32 %v1131_v41, %v1031_v34  ;;  %v1251_v44 = vpop.f32.mrf.mxu0 }
 0x122   : > { %v1298_v48 = vrot.slane %v1251_v44, 1  ;;  %v2846_v44 = vld [vmem:[%s3360_s26 + $0x10] sm:$0xff] }
 0x123   : > { %v804_v46 = vpop.f32.mrf.mxu1 }
 0x124   : > { %v846_v21 = vrot.slane %v804_v46, 1  ;;  %v1299_v47 = vsel %vm823_vm1, %v1297_v36, %v1298_v48 }
 0x125   : > { %v3353_v51 = vadd.f32 %v1299_v47, %v1151_v43 }
 0x126   : > { %v3351_v50 = vsel %vm823_vm1, %v845_v42, %v846_v21  ;;  %v2847_v42 = vld [vmem:[%s3360_s26 + $0x18] sm:$0xff] }
 0x127   : > { %v965_v40 = vpop.f32.mrf.mxu2  ;;  %v863_v46 = vadd.f32 %v3351_v50, %v3302_v53 }
 0x128   : > { %v1011_v54 = vrot.slane %v965_v40, 2  ;;  %v1133_v57 = vpop.f32.mrf.mxu3 }
 0x129   : > { %v1254_v58 = vpop.f32.mrf.mxu0 }
 0x12a   : > { %v1012_v61 = vsel %vm994_vm2, %v1010_v52, %v1011_v54  ;;  %v1300_v1 = vrot.slane %v1254_v58, 1 }
 0x12b   : > { %v1399_v37 = vpop.f32.mrf.mxu1  ;;  %v1032_v63 = vadd.f32 %v1012_v61, %v861_v60 }
 0x12c   : > { %1598 = vmatmul.bf16.gmra.mxu2 %v3296_v49  ;;  %1883 = vmatmul.bf16.gmra.mxu0 %v3173_v56  ;;  %v1455_v3 = vrot.slane %v1399_v37, 2 }
 0x12d   : > { %1713 = vmatmul.bf16.gmra.mxu3 %v3173_v56 }
 0x12e   : > { %2752 = vmatmul.msk.bf16.vlgmr.msra.gmra.mxu1 %vm1984_vm3, %v2844_v59 }
 0x12f   : > { %v968_v0 = vpop.f32.mrf.mxu2 }
 0x130   : > { %v1135_v2 = vpop.f32.mrf.mxu3  ;;  %v1013_v10 = vrot.slane %v968_v0, 2 }
 0x131   : > { %v1152_v5 = vadd.f32 %v1135_v2, %v1032_v63  ;;  %v1256_v25 = vpop.f32.mrf.mxu0 }
 0x132   : > { %v1301_v62 = vrot.slane %v1256_v25, 1 }
 0x133   : > { %v1401_v6 = vpop.f32.mrf.mxu1 }
 0x134   : > { %v1456_v7 = vrot.slane %v1401_v6, 2  ;;  %v1302_v8 = vsel %vm823_vm1, %v1300_v1, %v1301_v62 }
 0x135   : > { %v3371_v9 = vadd.f32 %v1302_v8, %v1152_v5 }
 0x136   : > { %v1457_v39 = vsel %vm994_vm2, %v1455_v3, %v1456_v7 }
 0x137   : > { %v1487_v56 = vadd.f32 %v1457_v39, %v3312_v17  ;;  %v970_v11 = vpop.f32.mrf.mxu2 }
 0x138   : > { %v1014_v12 = vrot.slane %v970_v11, 2  ;;  %v1137_v13 = vpop.f32.mrf.mxu3 }
 0x139   : > { %v1259_v14 = vpop.f32.mrf.mxu0 }
 0x13a   : > { %v1015_v23 = vsel %vm994_vm2, %v1013_v10, %v1014_v12  ;;  %v1303_v26 = vrot.slane %v1259_v14, 1 }
 0x13b   : > { %v1404_v18 = vpop.f32.mrf.mxu1  ;;  %v1033_v55 = vadd.f32 %v1015_v23, %v862_v16 }
 0x13c   : > { %1602 = vmatmul.bf16.gmra.mxu2 %v3057_v20  ;;  %1888 = vmatmul.bf16.gmra.mxu0 %v3296_v49  ;;  %v1458_v29 = vrot.slane %v1404_v18, 2 }
 0x13d   : > { %1718 = vmatmul.bf16.gmra.mxu3 %v3296_v49 }
 0x13e   : > { %2753 = vmatmul.msk.bf16.gmra.mxu1 %vm1984_vm3, %v2845_v15 }
 0x13f   : > { %v973_v17 = vpop.f32.mrf.mxu2 }
 0x140   : > { %v1139_v27 = vpop.f32.mrf.mxu3  ;;  %v1016_v49 = vrot.slane %v973_v17, 2 }
 0x141   : > { %v1153_v30 = vadd.f32 %v1139_v27, %v1033_v55  ;;  %v1261_v38 = vpop.f32.mrf.mxu0 }
 0x142   : > { %v1304_v19 = vrot.slane %v1261_v38, 1 }
 0x143   : > { %v1406_v31 = vpop.f32.mrf.mxu1 }
 0x144   : > { %v1459_v32 = vrot.slane %v1406_v31, 2  ;;  %v1305_v22 = vsel %vm823_vm1, %v1303_v26, %v1304_v19 }
 0x145   : > { %v3383_v24 = vadd.f32 %v1305_v22, %v1153_v30 }
 0x146   : > { %v1460_v33 = vsel %vm994_vm2, %v1458_v29, %v1459_v32 }
 0x147   : > { %v1488_v34 = vadd.f32 %v1460_v33, %v3322_v45  ;;  %v975_v35 = vpop.f32.mrf.mxu2 }
 0x148   : > { %v1017_v36 = vrot.slane %v975_v35, 2  ;;  %v1141_v41 = vpop.f32.mrf.mxu3 }
 0x149   : > { %v1264_v43 = vpop.f32.mrf.mxu0 }
 0x14a   : > { %v1018_v21 = vsel %vm994_vm2, %v1016_v49, %v1017_v36  ;;  %v1306_v52 = vrot.slane %v1264_v43, 1 }
 0x14b   : > { %v1409_v48 = vpop.f32.mrf.mxu1  ;;  %v1034_v47 = vadd.f32 %v1018_v21, %v863_v46 }
 0x14c   : > { %1893 = vmatmul.bf16.gmra.mxu0 %v3057_v20  ;;  %2755 = vmatmul.msk.bf16.vlgmr.msrb.gmra.mxu2 %vm1984_vm3, %v2847_v42  ;;  %v1461_v57 = vrot.slane %v1409_v48, 2 }
 0x14d   : > { %1723 = vmatmul.bf16.gmra.mxu3 %v3057_v20 }
 0x14e   : > { %2754 = vmatmul.msk.bf16.gmra.mxu1 %vm1984_vm3, %v2846_v44 }
 0x14f   : > { %v1575_v45 = vpop.f32.mrf.mxu2 }
 0x150   : > { %v1143_v40 = vpop.f32.mrf.mxu3  ;;  %v1607_v54 = vadd.f32 %v1575_v45, %v1487_v56 }
 0x151   : > { %v1154_v58 = vadd.f32 %v1143_v40, %v1034_v47  ;;  %v1266_v59 = vpop.f32.mrf.mxu0 }
 0x152   : > { %v1307_v53 = vrot.slane %v1266_v59, 1 }
 0x153   : > { %v1411_v50 = vpop.f32.mrf.mxu1 }
 0x154   : > { %v1462_v60 = vrot.slane %v1411_v50, 2  ;;  %v1308_v37 = vsel %vm823_vm1, %v1306_v52, %v1307_v53 }
 0x155   : > { %v3397_v63 = vadd.f32 %v1308_v37, %v1154_v58 }
 0x156   : > { %v1463_v61 = vsel %vm994_vm2, %v1461_v57, %v1462_v60 }
 0x157   : > { %v1489_v20 = vadd.f32 %v1463_v61, %v3332_v4  ;;  %v1577_v0 = vpop.f32.mrf.mxu2 }
 0x158   : > { %v1145_v1 = vpop.f32.mrf.mxu3 }
 0x159   : > { %v1859_v2 = vpop.f32.mrf.mxu0 }
 0x15a   : > { %v1915_v25 = vrot.slane %v1859_v2, 2 }
 0x15b   : > { %v1414_v3 = vpop.f32.mrf.mxu1 }
 0x15c   : > { %v1464_v7 = vrot.slane %v1414_v3, 2 }
 0x15f   : > { %v1579_v5 = vpop.f32.mrf.mxu2 }
 0x160   : > { %v3400_v62 = vadd.f32 %v1579_v5, %v1488_v34  ;;  %v1689_v6 = vpop.f32.mrf.mxu3 }
 0x161   : > { %v1861_v8 = vpop.f32.mrf.mxu0  ;;  %v1745_v15 = vrot.slane %v1689_v6, 1 }
 0x162   : > { %v1916_v10 = vrot.slane %v1861_v8, 2 }
 0x163   : > { %v1416_v39 = vpop.f32.mrf.mxu1 }
 0x164   : > { %v1465_v56 = vrot.slane %v1416_v39, 2  ;;  %v1917_v11 = vsel %vm994_vm2, %v1915_v25, %v1916_v10 }
 0x166   : > { %v1466_v12 = vsel %vm994_vm2, %v1464_v7, %v1465_v56 }
 0x167   : > { %v3405_v4 = vadd.f32 %v1466_v12, %v3341_v28  ;;  %v1581_v13 = vpop.f32.mrf.mxu2 }
 0x168   : > { %v1691_v14 = vpop.f32.mrf.mxu3 }
 0x169   : > { %v1746_v16 = vrot.slane %v1691_v14, 1  ;;  %v1864_v18 = vpop.f32.mrf.mxu0 }
 0x16a   : > { %v1918_v10 = vrot.slane %v1864_v18, 2 }
 0x16b   : > { %v1419_v23 = vpop.f32.mrf.mxu1  ;;  %v1747_v55 = vsel %vm823_vm1, %v1745_v15, %v1746_v16 }
 0x16c   : > { %v1777_v17 = vadd.f32 %v1747_v55, %v1607_v54  ;;  %v1467_v38 = vrot.slane %v1419_v23, 2 }
 0x16e   : > { %v1947_v26 = vadd.f32 %v1917_v11, %v1777_v17 }
 0x16f   : > { %v1583_v27 = vpop.f32.mrf.mxu2 }
 0x170   : > { %v3408_v29 = vadd.f32 %v1583_v27, %v1489_v20  ;;  %v1694_v30 = vpop.f32.mrf.mxu3 }
 0x171   : > { %v1866_v19 = vpop.f32.mrf.mxu0  ;;  %v1748_v6 = vrot.slane %v1694_v30, 1 }
 0x172   : > { %v1919_v56 = vrot.slane %v1866_v19, 2 }
 0x173   : > { %v1421_v31 = vpop.f32.mrf.mxu1 }
 0x174   : > { %v1468_v32 = vrot.slane %v1421_v31, 2  ;;  %v1920_v15 = vsel %vm994_vm2, %v1918_v10, %v1919_v56 }
 0x176   : > { %v1469_v28 = vsel %vm994_vm2, %v1467_v38, %v1468_v32 }
 0x177   : > { %v3412_v22 = vadd.f32 %v1469_v28, %v3353_v51  ;;  %v1585_v33 = vpop.f32.mrf.mxu2 }
 0x178   : > { %v1696_v49 = vpop.f32.mrf.mxu3 }
 0x179   : > { %v3414_v34 = vpop.f32.mrf.mxu0  ;;  %v1749_v5 = vrot.slane %v1696_v49, 1 }
 0x17a   : > { %v1921_v28 = vrot.slane %v3414_v34, 2 }
 0x17b   : > { %v1424_v35 = vpop.f32.mrf.mxu1  ;;  %v1750_v8 = vsel %vm823_vm1, %v1748_v6, %v1749_v5 }
 0x17c   : > { %v1470_v42 = vrot.slane %v1424_v35, 2  ;;  %v1778_v11 = vadd.f32 %v1750_v8, %v3400_v62 }
 0x17e   : > { %v1948_v23 = vadd.f32 %v1920_v15, %v1778_v11 }
 0x17f   : > { %v3416_v36 = vpop.f32.mrf.mxu2 }
 0x180   : > { %v1699_v41 = vpop.f32.mrf.mxu3 }
 0x181   : > { %v3418_v43 = vpop.f32.mrf.mxu0  ;;  %v1751_v38 = vrot.slane %v1699_v41, 1 }
 0x182   : > { %v1922_v33 = vrot.slane %v3418_v43, 2 }
 0x183   : > { %v1426_v44 = vpop.f32.mrf.mxu1 }
 0x184   : > { %v1471_v46 = vrot.slane %v1426_v44, 2  ;;  %v1923_v43 = vsel %vm994_vm2, %v1921_v28, %v1922_v33 }
 0x186   : > { %v1472_v48 = vsel %vm994_vm2, %v1470_v42, %v1471_v46 }
 0x187   : > { %v3422_v21 = vadd.f32 %v1472_v48, %v3371_v9  ;;  %v1589_v51 = vpop.f32.mrf.mxu2 }
 0x188   : > { %v1701_v47 = vpop.f32.mrf.mxu3  ;;  %v1610_v51 = vadd.f32 %v3416_v36, %v3405_v4 }
 0x189   : > { %v3424_v45 = vpop.f32.mrf.mxu0  ;;  %v1752_v55 = vrot.slane %v1701_v47, 1 }
 0x18a   : > { %v1924_v47 = vrot.slane %v3424_v45, 2 }
 0x18b   : > { %v1429_v52 = vpop.f32.mrf.mxu1  ;;  %v1753_v62 = vsel %vm823_vm1, %v1751_v38, %v1752_v55 }
 0x18c   : > { %v1473_v57 = vrot.slane %v1429_v52, 2  ;;  %v1779_v44 = vadd.f32 %v1753_v62, %v3408_v29 }
 0x18e   : > { %v1949_v52 = vadd.f32 %v1923_v43, %v1779_v44 }
 0x18f   : > { %v3426_v40 = vpop.f32.mrf.mxu2 }
 0x190   : > { %v1704_v54 = vpop.f32.mrf.mxu3  ;;  %v1611_v8 = vadd.f32 %v3426_v40, %v3412_v22 }
 0x191   : > { %v3428_v58 = vpop.f32.mrf.mxu0  ;;  %v1754_v49 = vrot.slane %v1704_v54, 1 }
 0x192   : > { %v1925_v34 = vrot.slane %v3428_v58, 2 }
 0x193   : > { %v1431_v59 = vpop.f32.mrf.mxu1 }
 0x194   : > { %v1474_v53 = vrot.slane %v1431_v59, 2  ;;  %v1926_v29 = vsel %vm994_vm2, %v1924_v47, %v1925_v34 }
 0x196   : > { %v1475_v50 = vsel %vm994_vm2, %v1473_v57, %v1474_v53 }
 0x197   : > { %v3432_v60 = vadd.f32 %v1475_v50, %v3383_v24  ;;  %v1593_v9 = vpop.f32.mrf.mxu2 }
 0x198   : > { %v1706_v37 = vpop.f32.mrf.mxu3 }
 0x199   : > { %v3434_v61 = vpop.f32.mrf.mxu0 }
 0x19b   : > { %v3436_v20 = vpop.f32.mrf.mxu1 }
 0x19f   : > { %v3438_v0 = vpop.f32.mrf.mxu2 }
 0x1a0   : > { %v3440_v1 = vpop.f32.mrf.mxu3 }
 0x1a1   : > { %v3442_v2 = vpop.f32.mrf.mxu0  ;;  %v1757_v36 = vrot.slane %v3440_v1, 1 }
 0x1a2   : > { %v1928_v11 = vrot.slane %v3442_v2, 2 }
 0x1a3   : > { %v3444_v3 = vpop.f32.mrf.mxu1 }
 0x1a7   : > { %v1597_v25 = vpop.f32.mrf.mxu2 }
 0x1a8   : > { %v1711_v7 = vpop.f32.mrf.mxu3 }
 0x1a9   : > { %v3446_v24 = vpop.f32.mrf.mxu0  ;;  %v1758_v9 = vrot.slane %v1711_v7, 1  ;;  %v1927_v7 = vrot.slane %v3434_v61, 2 }
 0x1aa   : > { %v1930_v22 = vrot.slane %v3446_v24, 2 }
 0x1ab   : > { %v2010_v39 = vpop.f32.mrf.mxu1  ;;  %v1759_v58 = vsel %vm823_vm1, %v1757_v36, %v1758_v9  ;;  %v1929_v61 = vsel %vm994_vm2, %v1927_v7, %v1928_v11 }
 0x1ac   : > { %v2030_v12 = vadd.f32 %v2010_v39, %v1947_v26  ;;  %v1755_v26 = vrot.slane %v1706_v37, 1 }
 0x1ae   : > { %v2046_v27 = vmul.f32 0.2, %v2030_v12  ;;  %vm2038_vm4 = vcmp.ge.f32.partialorder %v2030_v12, 0.0  ;;  %v1756_v46 = vsel %vm823_vm1, %v1754_v49, %v1755_v26 }
 0x1af   : > { %v3450_v13 = vpop.f32.mrf.mxu2  ;;  %v1780_v54 = vadd.f32 %v1756_v46, %v1610_v51 }
 0x1b0   : > { %v1714_v14 = vpop.f32.mrf.mxu3  ;;  %v2054_v19 = vsel %vm2038_vm4, %v2030_v12, %v2046_v27  ;;  %v1612_v27 = vadd.f32 %v3438_v0, %v3422_v21  ;;  %v1613_v24 = vadd.f32 %v3450_v13, %v3432_v60 }
 0x1b1   : > { %v3453_v16 = vpop.f32.mrf.mxu0  ;;  %v1950_v50 = vadd.f32 %v1926_v29, %v1780_v54  ;;  %v1760_v12 = vrot.slane %v1714_v14, 1 }
 0x1b2   : > { %v1931_v40 = vrot.slane %v3453_v16, 2 }
 0x1b3   : > { %v2012_v17 = vpop.f32.mrf.mxu1 }
 0x1b4   : > { %v2031_v30 = vadd.f32 %v2012_v17, %v1948_v23  ;;  %v1781_v23 = vadd.f32 %v1759_v58, %v1611_v8 }
 0x1b6   : > { %vm2039_vm5 = vcmp.ge.f32.partialorder %v2031_v30, 0.0  ;;  %v2047_v18 = vmul.f32 0.2, %v2031_v30  ;;  %v1951_v2 = vadd.f32 %v1929_v61, %v1781_v23 }
 0x1b7   : > { %v1601_v32 = vpop.f32.mrf.mxu2 }
 0x1b8   : > { %v2055_v31 = vsel %vm2039_vm5, %v2031_v30, %v2047_v18  ;;  %v1716_v41 = vpop.f32.mrf.mxu3  ;;  %v1477_v32 = vrot.slane %v3444_v3, 2 }
 0x1b9   : > { %v2851_v35 = vpack.c.bf16 %v2055_v31, %v2054_v19  ;;  %v3465_v42 = vpop.f32.mrf.mxu0  ;;  %v1761_v6 = vrot.slane %v1716_v41, 1  ;;  %v1932_v19 = vsel %vm994_vm2, %v1930_v22, %v1931_v40  ;;  %v1476_v31 = vrot.slane %v3436_v20, 2 }
 0x1ba   : > { %v1933_v28 = vrot.slane %v3465_v42, 2 }
 0x1bb   : > { %2852 = vst [vmem:[%s3461_s29] sm:$0xff] %v2851_v35   ;;  %v2015_v48 = vpop.f32.mrf.mxu1  ;;  %v1762_v55 = vsel %vm823_vm1, %v1760_v12, %v1761_v6  ;;  %v1478_v44 = vsel %vm994_vm2, %v1476_v31, %v1477_v32 }
 0x1bc   : > { %v2032_v57 = vadd.f32 %v2015_v48, %v1949_v52  ;;  %v1782_v14 = vadd.f32 %v1762_v55, %v1612_v27  ;;  %v1494_v60 = vadd.f32 %v1478_v44, %v3397_v63 }
 0x1be   : > { %v2048_v25 = vmul.f32 0.2, %v2032_v57  ;;  %vm2040_vm6 = vcmp.ge.f32.partialorder %v2032_v57, 0.0  ;;  %v1952_v0 = vadd.f32 %v1932_v19, %v1782_v14 }
 0x1bf   : > { %v3475_v59 = vpop.f32.mrf.mxu2 }
 0x1c0   : > { %v1719_v53 = vpop.f32.mrf.mxu3  ;;  %v2056_v39 = vsel %vm2040_vm6, %v2032_v57, %v2048_v25 }
 0x1c1   : > { %v1891_v37 = vpop.f32.mrf.mxu0  ;;  %v1763_v18 = vrot.slane %v1719_v53, 1  ;;  %v1614_v53 = vadd.f32 %v3475_v59, %v1494_v60 }
 0x1c2   : > { %v1934_v33 = vrot.slane %v1891_v37, 2 }
 0x1c3   : > { %v2017_v5 = vpop.f32.mrf.mxu1 }
 0x1c4   : > { %v2033_v4 = vadd.f32 %v2017_v5, %v1950_v50  ;;  %v1935_v51 = vsel %vm994_vm2, %v1933_v28, %v1934_v33 }
 0x1c6   : > { %vm2041_vm7 = vcmp.ge.f32.partialorder %v2033_v4, 0.0  ;;  %v2049_v45 = vmul.f32 0.2, %v2033_v4 }
 0x1c7   : > { %v1605_v56 = vpop.f32.mrf.mxu2 }
 0x1c8   : > { %v2057_v10 = vsel %vm2041_vm7, %v2033_v4, %v2049_v45  ;;  %v1721_v1 = vpop.f32.mrf.mxu3 }
 0x1c9   : > { %v2856_v15 = vpack.c.bf16 %v2057_v10, %v2056_v39  ;;  %v1894_v30 = vpop.f32.mrf.mxu0  ;;  %v1764_v38 = vrot.slane %v1721_v1, 1 }
 0x1ca   : > { %v1936_v43 = vrot.slane %v1894_v30, 2 }
 0x1cb   : > { %2868 = vst [vmem:[%s3461_s29 + $0x8] sm:$0xff] %v2856_v15   ;;  %v2020_v17 = vpop.f32.mrf.mxu1  ;;  %v1765_v21 = vsel %vm823_vm1, %v1763_v18, %v1764_v38 }
 0x1cc   : > { %v2034_v62 = vadd.f32 %v2020_v17, %v1951_v2  ;;  %v1783_v41 = vadd.f32 %v1765_v21, %v1613_v24 }
 0x1ce   : > { %v2050_v49 = vmul.f32 0.2, %v2034_v62  ;;  %vm2042_vm8 = vcmp.ge.f32.partialorder %v2034_v62, 0.0  ;;  %v1953_v13 = vadd.f32 %v1935_v51, %v1783_v41 }
 0x1cf   : > { %v2025_v46 = vpop.f32.mrf.mxu2 }
 0x1d0   : > { %v1724_v26 = vpop.f32.mrf.mxu3  ;;  %v2058_v48 = vsel %vm2042_vm8, %v2034_v62, %v2050_v49  ;;  %v2036_v50 = vadd.f32 %v2025_v46, %v1953_v13 }
 0x1d1   : > { %v1896_v3 = vpop.f32.mrf.mxu0  ;;  %v1766_v52 = vrot.slane %v1724_v26, 1 }
 0x1d2   : > { %v1937_v54 = vrot.slane %v1896_v3, 2  ;;  %v2052_v63 = vmul.f32 0.2, %v2036_v50  ;;  %vm2044_vm10 = vcmp.ge.f32.partialorder %v2036_v50, 0.0 }
 0x1d3   : > { %v2022_v16 = vpop.f32.mrf.mxu1 }
 0x1d4   : > { %v2035_v35 = vadd.f32 %v2022_v16, %v1952_v0  ;;  %v1938_v37 = vsel %vm994_vm2, %v1936_v43, %v1937_v54  ;;  %v2060_v45 = vsel %vm2044_vm10, %v2036_v50, %v2052_v63 }
 0x1d6   : > { %vm2043_vm9 = vcmp.ge.f32.partialorder %v2035_v35, 0.0  ;;  %v2051_v20 = vmul.f32 0.2, %v2035_v35 }
 0x1d7   : > { %v2027_v25 = vpop.f32.mrf.mxu2 }
 0x1d8   : > { %v2059_v47 = vsel %vm2043_vm9, %v2035_v35, %v2051_v20  ;;  %v1726_v34 = vpop.f32.mrf.mxu3 }
 0x1d9   : > { %v2861_v42 = vpack.c.bf16 %v2059_v47, %v2058_v48  ;;  %v1767_v57 = vrot.slane %v1726_v34, 1 }
 0x1db   : > { %2869 = vst [vmem:[%s3461_s29 + $0x10] sm:$0xff] %v2861_v42   ;;  %v1768_v29 = vsel %vm823_vm1, %v1766_v52, %v1767_v57 }
 0x1dc   : > { %v1784_v9 = vadd.f32 %v1768_v29, %v1614_v53 }
 0x1de   : > { %v1954_v5 = vadd.f32 %v1938_v37, %v1784_v9 }
 0x1e0   : > { %v2037_v4 = vadd.f32 %v2027_v25, %v1954_v5 }
 0x1e2   : > { %vm2045_vm11 = vcmp.ge.f32.partialorder %v2037_v4, 0.0  ;;  %v2053_v36 = vmul.f32 0.2, %v2037_v4 }
 0x1e4   : > { %v2061_v58 = vsel %vm2045_vm11, %v2037_v4, %v2053_v36 }
 0x1e5   : > { %v2866_v6 = vpack.c.bf16 %v2061_v58, %v2060_v45 }
 0x1e7   : > { %2870 = vst [vmem:[%s3461_s29 + $0x18] sm:$0xff] %v2866_v6  }
 0x1e8 PF: > { %s16_s22 = sadd.s32 1, %s2935_s22   ;;  %s3522_s21 = smov %s2931_s0 }
 0x1e9   : > { %p13_p5 = scmp.ge.s32.totalorder %s16_s22, 4   ;;  %s3523_s0 = smov %s3525_s2 }
 0x1eb   :  { %15 = sbr.rel (!%p13_p5) target bundleno = 2 (0x2), region = 97 }

</bundles_post_ra>
